<compile_context>
chip_gen: v5e
topology: v5e:2x2
jax: 0.10.0
libtpu: 0.0.40
codegen_flags: <defaults>
</compile_context>

<pallas_src>
import jax
import jax.numpy as jnp
from jax.experimental import pallas as pl
from jax.experimental.pallas import tpu as pltpu

# (Cin, Cout, filter_size) for the six blocks of TinyBinaryDetector.
BLOCK_CFG = [(3, 6, 15), (6, 12, 7), (12, 24, 5), (24, 48, 3), (48, 96, 3), (96, 192, 3)]
BN_EPS = 1e-5


# ----------------------------------------------------------------------------
# Small wrapper-side helpers (pure layout plumbing, no math).
# ----------------------------------------------------------------------------
def _expand_kw(x, k):
    """(N, H, C, W) -> (N, H, K*C, W-K+1) with slab[..., kw*C+c, wo] = x[..., c, wo+kw]."""
    wo = x.shape[-1] - k + 1
    return jnp.concatenate([x[:, :, :, i:i + wo] for i in range(k)], axis=2)


def _pool_sel(wo, wp):
    """0/1 column selectors for the 2x2 max pool along W (hoisted constants)."""
    wi = jax.lax.broadcasted_iota(jnp.int32, (wo, wp), 0)
    pi = jax.lax.broadcasted_iota(jnp.int32, (wo, wp), 1)
    return jnp.stack([(wi == 2 * pi), (wi == 2 * pi + 1)]).astype(jnp.bfloat16)


def _pick_rows(hp, cap=16):
    """Largest divisor of hp that is <= cap (pooled rows per grid step)."""
    best = 1
    for d in range(1, min(hp, cap) + 1):
        if hp % d == 0:
            best = d
    return best


# ----------------------------------------------------------------------------
# Conv block kernel (blocks 1-4 pattern, used standalone for blocks 1-3):
#   Conv2d(valid, stride 1, no bias) -> ReLU -> BatchNorm(eval) -> MaxPool2d(2,2)
# ----------------------------------------------------------------------------
def _conv_block_kernel(xe_ref, w_ref, bn_ref, sel_ref, o_ref):
    # xe_ref : (1, H, KW*Cin, WO)   kw-expanded input slab (bf16), whole image
    # w_ref  : (KH, Cout, KW*Cin)   lane-dense folded conv weights (bf16)
    # bn_ref : (2, Cout, 1)         [scale; shift] of eval-mode BN (f32)
    # sel_ref: (2, WO, WP)          even/odd column selectors (bf16)
    # o_ref  : (1, R, Cout, WP)     pooled bf16 output rows for this chunk
    kh_sz = w_ref.shape[0]
    r_rows = o_ref.shape[1]
    sc = bn_ref[0]
    sh = bn_ref[1]
    w_taps = [w_ref[i] for i in range(kh_sz)]        # hoisted (loop-invariant LHS)
    base = 2 * r_rows * pl.program_id(1)             # first conv row of the chunk

    @pl.loop(0, r_rows)
    def _(r):
        c0 = base + 2 * r
        # two conv rows per pooled row; each is KH matmuls with contraction KW*Cin
        acc0 = jnp.dot(w_taps[0], xe_ref[0, c0, :, :], preferred_element_type=jnp.float32)
        acc1 = jnp.dot(w_taps[0], xe_ref[0, c0 + 1, :, :], preferred_element_type=jnp.float32)
        for kh in range(1, kh_sz):                    # static unroll (<= 15)
            acc0 = acc0 + jnp.dot(w_taps[kh], xe_ref[0, c0 + kh, :, :],
                                  preferred_element_type=jnp.float32)
            acc1 = acc1 + jnp.dot(w_taps[kh], xe_ref[0, c0 + kh + 1, :, :],
                                  preferred_element_type=jnp.float32)
        b0 = jnp.maximum(acc0, 0.0) * sc + sh         # ReLU -> BN (eval)
        b1 = jnp.maximum(acc1, 0.0) * sc + sh
        rmax = jnp.maximum(b0, b1).astype(jnp.bfloat16)   # 2x1 pool over H (fused)
        pooled = jnp.maximum(                              # 1x2 pool over W (MXU select)
            jnp.dot(rmax, sel_ref[0], preferred_element_type=jnp.float32),
            jnp.dot(rmax, sel_ref[1], preferred_element_type=jnp.float32))
        o_ref[0, r] = pooled.astype(o_ref.dtype)


def conv_block(x, w_taps, bn, k):
    n, h, c_in, w_in = x.shape
    kh_sz, c_out, kc = w_taps.shape
    assert kh_sz == k and kc == k * c_in
    ho, wo = h - k + 1, w_in - k + 1
    hp, wp = ho // 2, wo // 2
    r = _pick_rows(hp)
    xe = _expand_kw(x, k)                 # wrapper-side im2col along kw (bf16)
    sel = _pool_sel(wo, wp)
    return pl.pallas_call(
        _conv_block_kernel,
        out_shape=jax.ShapeDtypeStruct((n, hp, c_out, wp), jnp.bfloat16),
        grid=(n, hp // r),
        in_specs=[
            pl.BlockSpec((1, h, kc, wo), lambda i, j: (i, 0, 0, 0)),
            pl.BlockSpec((kh_sz, c_out, kc), lambda i, j: (0, 0, 0)),
            pl.BlockSpec((2, c_out, 1), lambda i, j: (0, 0, 0)),
            pl.BlockSpec((2, wo, wp), lambda i, j: (0, 0, 0)),
        ],
        out_specs=pl.BlockSpec((1, r, c_out, wp), lambda i, j: (i, j, 0, 0)),
        compiler_params=pltpu.CompilerParams(
            dimension_semantics=("parallel", "parallel"),
            vmem_limit_bytes=32 * 1024 * 1024),
    )(xe, w_taps, bn, sel)


# ----------------------------------------------------------------------------
# Fused tail kernel: blocks 4, 5, 6 + AdaptiveAvgPool2d((1,1)) + Flatten +
# Linear(192, 4) + box scaling / clamping (inference path).
# ----------------------------------------------------------------------------
def _tail_kernel(xe4_ref, w4_ref, bn4_ref, sel4_ref,
                 w5_ref, bn5_ref, sel5_ref,
                 w6_ref, bn6_ref, sel6_ref,
                 wfc_ref, bfc_ref, mbox_ref, bounds_ref,
                 o_ref, p4_ref, p5_ref, p6_ref):
    # ---- block 4: folded-kw conv (contraction 72) + relu + bn + pool --------
    hp4, c4, _ = p4_ref.shape
    wo4 = xe4_ref.shape[3]
    sc4, sh4 = bn4_ref[0], bn4_ref[1]

    @pl.loop(0, hp4)
    def _(ph):
        rows = []
        for par in range(2):
            c = 2 * ph + par
            acc = jnp.zeros((c4, wo4), jnp.float32)
            for kh in range(3):
                acc = acc + jnp.dot(w4_ref[kh], xe4_ref[0, c + kh, :, :],
                                    preferred_element_type=jnp.float32)
            rows.append(jnp.maximum(acc, 0.0) * sc4 + sh4)
        rmax = jnp.maximum(rows[0], rows[1]).astype(jnp.bfloat16)
        p4_ref[ph] = jnp.maximum(
            jnp.dot(rmax, sel4_ref[0], preferred_element_type=jnp.float32),
            jnp.dot(rmax, sel4_ref[1], preferred_element_type=jnp.float32),
        ).astype(p4_ref.dtype)

    # ---- block 5: per-tap conv (contraction Cin=48) --------------------------
    hp5, c5, _ = p5_ref.shape
    wo5 = p4_ref.shape[2] - 2
    sc5, sh5 = bn5_ref[0], bn5_ref[1]

    @pl.loop(0, hp5)
    def _(ph):
        rows = []
        for par in range(2):
            c = 2 * ph + par
            acc = jnp.zeros((c5, wo5), jnp.float32)
            for kh in range(3):
                src = p4_ref[c + kh]                    # (48, WP4) bf16
                for kw in range(3):
                    acc = acc + jnp.dot(w5_ref[kh * 3 + kw], src[:, kw:kw + wo5],
                                        preferred_element_type=jnp.float32)
            rows.append(jnp.maximum(acc, 0.0) * sc5 + sh5)
        rmax = jnp.maximum(rows[0], rows[1]).astype(jnp.bfloat16)
        p5_ref[ph] = jnp.maximum(
            jnp.dot(rmax, sel5_ref[0], preferred_element_type=jnp.float32),
            jnp.dot(rmax, sel5_ref[1], preferred_element_type=jnp.float32),
        ).astype(p5_ref.dtype)

    # ---- block 6: per-tap conv (contraction Cin=96) --------------------------
    hp6, c6, wp6 = p6_ref.shape
    wo6 = p5_ref.shape[2] - 2
    sc6, sh6 = bn6_ref[0], bn6_ref[1]

    @pl.loop(0, hp6)
    def _(ph):
        rows = []
        for par in range(2):
            c = 2 * ph + par
            acc = jnp.zeros((c6, wo6), jnp.float32)
            for kh in range(3):
                src = p5_ref[c + kh]                    # (96, WP5) bf16
                for kw in range(3):
                    acc = acc + jnp.dot(w6_ref[kh * 3 + kw], src[:, kw:kw + wo6],
                                        preferred_element_type=jnp.float32)
            rows.append(jnp.maximum(acc, 0.0) * sc6 + sh6)
        rmax = jnp.maximum(rows[0], rows[1]).astype(jnp.bfloat16)
        p6_ref[ph] = jnp.maximum(
            jnp.dot(rmax, sel6_ref[0], preferred_element_type=jnp.float32),
            jnp.dot(rmax, sel6_ref[1], preferred_element_type=jnp.float32))

    # ---- head: global avg pool + flatten + fc + box scale / clamp -----------
    p6 = p6_ref[...]                                    # (HP6, 192, WP6) f32
    feats = jnp.sum(jnp.sum(p6, axis=2), axis=0, keepdims=True) * (1.0 / (hp6 * wp6))
    logits = jnp.dot(feats, wfc_ref[...], preferred_element_type=jnp.float32) + bfc_ref[...]
    scaled = logits * bounds_ref[...]                   # [p0*w, p1*h, p2*w, p3*h]
    boxes = jnp.dot(scaled, mbox_ref[...],
                    preferred_element_type=jnp.float32)  # [x0, y0, x0+p2*w, y0+p3*h]
    o_ref[0] = jnp.clip(boxes, 0.0, bounds_ref[...])     # inference clamps


def tail_block(x3, p4, p5, p6, w_fc, b_fc, img_w, img_h):
    n, h4, c_in4, w4dim = x3.shape
    k = 3
    ho4, wo4 = h4 - 2, w4dim - 2
    hp4, wp4 = ho4 // 2, wo4 // 2
    ho5, wo5 = hp4 - 2, wp4 - 2
    hp5, wp5 = ho5 // 2, wo5 // 2
    ho6, wo6 = hp5 - 2, wp5 - 2
    hp6, wp6 = ho6 // 2, wo6 // 2
    c4, c5, c6 = p4["w"].shape[1], p5["w"].shape[1], p6["w"].shape[1]

    xe4 = _expand_kw(x3, k)
    sel4, sel5, sel6 = _pool_sel(wo4, wp4), _pool_sel(wo5, wp5), _pool_sel(wo6, wp6)
    mbox = jnp.array([[1., 0., 1., 0.],
                      [0., 1., 0., 1.],
                      [0., 0., 1., 0.],
                      [0., 0., 0., 1.]], jnp.float32)
    bounds = jnp.array([[img_w, img_h, img_w, img_h]], jnp.float32)
    wfc_t = jnp.transpose(w_fc).astype(jnp.float32)     # (192, 4)
    bfc = b_fc.reshape(1, 4).astype(jnp.float32)

    out = pl.pallas_call(
        _tail_kernel,
        out_shape=jax.ShapeDtypeStruct((n, 1, 4), jnp.float32),
        grid=(n,),
        in_specs=[
            pl.BlockSpec((1, h4, k * c_in4, wo4), lambda i: (i, 0, 0, 0)),
            pl.BlockSpec(p4["w"].shape, lambda i: (0, 0, 0)),
            pl.BlockSpec((2, c4, 1), lambda i: (0, 0, 0)),
            pl.BlockSpec((2, wo4, wp4), lambda i: (0, 0, 0)),
            pl.BlockSpec(p5["w"].shape, lambda i: (0, 0, 0)),
            pl.BlockSpec((2, c5, 1), lambda i: (0, 0, 0)),
            pl.BlockSpec((2, wo5, wp5), lambda i: (0, 0, 0)),
            pl.BlockSpec(p6["w"].shape, lambda i: (0, 0, 0)),
            pl.BlockSpec((2, c6, 1), lambda i: (0, 0, 0)),
            pl.BlockSpec((2, wo6, wp6), lambda i: (0, 0, 0)),
            pl.BlockSpec((192, 4), lambda i: (0, 0)),
            pl.BlockSpec((1, 4), lambda i: (0, 0)),
            pl.BlockSpec((4, 4), lambda i: (0, 0)),
            pl.BlockSpec((1, 4), lambda i: (0, 0)),
        ],
        out_specs=pl.BlockSpec((1, 1, 4), lambda i: (i, 0, 0)),
        scratch_shapes=[
            pltpu.VMEM((hp4, c4, wp4), jnp.bfloat16),
            pltpu.VMEM((hp5, c5, wp5), jnp.bfloat16),
            pltpu.VMEM((hp6, c6, wp6), jnp.float32),
        ],
        compiler_params=pltpu.CompilerParams(
            dimension_semantics=("parallel",),
            vmem_limit_bytes=32 * 1024 * 1024),
    )(xe4, p4["w"], p4["bn"], sel4,
      p5["w"], p5["bn"], sel5,
      p6["w"], p6["bn"], sel6,
      wfc_t, bfc, mbox, bounds)
    return out.reshape(n, 4)


# ----------------------------------------------------------------------------
# Deterministic parameter init (shapes from TinyBinaryDetector.__init__).
# ----------------------------------------------------------------------------
def init_params(key):
    blocks = []
    for bi, (cin, cout, k) in enumerate(BLOCK_CFG):
        key, sub = jax.random.split(key)
        fan_in = cin * k * k
        w = jax.random.normal(sub, (cout, cin, k, k), jnp.float32) * jnp.sqrt(2.0 / fan_in)
        if bi < 4:
            # folded along kw: (KH, Cout, KW*Cin), index [kh, cout, kw*Cin + cin]
            w_k = jnp.transpose(w, (2, 0, 3, 1)).reshape(k, cout, k * cin)
        else:
            # per-tap: (KH*KW, Cout, Cin), index [kh*KW + kw, cout, cin]
            w_k = jnp.transpose(w, (2, 3, 0, 1)).reshape(k * k, cout, cin)
        # BatchNorm2d, PyTorch default init, eval mode: gamma=1, beta=0, mean=0, var=1
        gamma = jnp.ones((cout,), jnp.float32)
        beta = jnp.zeros((cout,), jnp.float32)
        r_mean = jnp.zeros((cout,), jnp.float32)
        r_var = jnp.ones((cout,), jnp.float32)
        scale = gamma / jnp.sqrt(r_var + BN_EPS)
        shift = beta - r_mean * scale
        bn = jnp.stack([scale, shift], axis=0).reshape(2, cout, 1)
        blocks.append(dict(k=k, w=w_k.astype(jnp.bfloat16), bn=bn))
    key, k1, k2 = jax.random.split(key, 3)
    bound = 1.0 / jnp.sqrt(192.0)
    w_fc = jax.random.uniform(k1, (4, 192), jnp.float32, -bound, bound)
    b_fc = jax.random.uniform(k2, (4,), jnp.float32, -bound, bound)
    return blocks, w_fc, b_fc


# ----------------------------------------------------------------------------
# Forward (inference path of TinyBinaryDetector.forward, targets=None).
# ----------------------------------------------------------------------------
def tiny_binary_detector_forward(imgs_nchw, params, w_fc, b_fc):
    # imgs_nchw: (N, 3, H, W) float32 (stacked image list).
    n, _, h, w = imgs_nchw.shape
    x = jnp.transpose(imgs_nchw, (0, 2, 1, 3)).astype(jnp.bfloat16)   # (N, H, C, W)
    for p in params[:3]:                       # blocks 1-3: one pallas_call each
        x = conv_block(x, p["w"], p["bn"], p["k"])
    boxes = tail_block(x, params[3], params[4], params[5],   # blocks 4-6 + head fused
                       w_fc, b_fc, float(w), float(h))
    # TODO(synk): training branch (compute_loss MSE over targets) not implemented;
    # only the targets=None inference path is reproduced.
    return [
        {"boxes": boxes[i:i + 1],
         "labels": jnp.ones((1,), jnp.int32),   # TODO(synk): torch uses int64 (needs jax x64)
         "scores": jnp.ones((1,), jnp.float32)}
        for i in range(n)
    ]


if __name__ == "__main__":
    key = jax.random.PRNGKey(0)
    key, pkey, xkey = jax.random.split(key, 3)
    params, w_fc, b_fc = init_params(pkey)
    # Six valid-conv + 2x2-pool stages need >= 218x218 inputs; 224x224 is the
    # smallest round size that survives the whole feature stack.
    imgs = jax.random.uniform(xkey, (2, 3, 224, 224), jnp.float32)
    preds = tiny_binary_detector_forward(imgs, params, w_fc, b_fc)
    jax.block_until_ready([p["boxes"] for p in preds])
    assert all(p["boxes"].shape == (1, 4) for p in preds)
    assert all(bool(jnp.all(jnp.isfinite(p["boxes"]))) for p in preds)
    print("KERNEL_OK")
</pallas_src>

<mosaic_0001>
module attributes {stable_mosaic.version = 11 : i64} {
  func.func @_conv_block_kernel(%arg0: i32, %arg1: i32, %arg2: memref<1x224x45x210xbf16, #tpu.memory_space<vmem>>, %arg3: memref<15x6x45xbf16, #tpu.memory_space<vmem>>, %arg4: memref<2x6x1xf32, #tpu.memory_space<vmem>>, %arg5: memref<2x210x105xbf16, #tpu.memory_space<vmem>>, %arg6: memref<1x15x6x105xbf16, #tpu.memory_space<vmem>>) attributes {dimension_semantics = [#tpu.dimension_semantics<parallel>, #tpu.dimension_semantics<parallel>], iteration_bounds = array<i64: 2, 7>, scalar_prefetch = 0 : i64, scratch_operands = 0 : i64, tpu.core_type = #tpu.core_type<tc>, window_params = [{transform_indices = @transform_0, window_bounds = array<i64: 1, 224, 45, 210>}, {pipeline_mode = #tpu.pipeline_mode<synchronous>, transform_indices = @transform_1, window_bounds = array<i64: 15, 6, 45>}, {pipeline_mode = #tpu.pipeline_mode<synchronous>, transform_indices = @transform_2, window_bounds = array<i64: 2, 6, 1>}, {pipeline_mode = #tpu.pipeline_mode<synchronous>, transform_indices = @transform_3, window_bounds = array<i64: 2, 210, 105>}, {transform_indices = @transform_4, window_bounds = array<i64: 1, 15, 6, 105>}]} {
    %c0 = arith.constant 0 : index
    %c0_0 = arith.constant 0 : index
    %c0_1 = arith.constant 0 : index
    %0 = vector.load %arg4[%c0, %c0_0, %c0_1] : memref<2x6x1xf32, #tpu.memory_space<vmem>>, vector<1x6x1xf32>
    %1 = vector.shape_cast %0 : vector<1x6x1xf32> to vector<6x1xf32>
    %c1 = arith.constant 1 : index
    %c0_2 = arith.constant 0 : index
    %c0_3 = arith.constant 0 : index
    %2 = vector.load %arg4[%c1, %c0_2, %c0_3] : memref<2x6x1xf32, #tpu.memory_space<vmem>>, vector<1x6x1xf32>
    %3 = vector.shape_cast %2 : vector<1x6x1xf32> to vector<6x1xf32>
    %c0_4 = arith.constant 0 : index
    %c0_5 = arith.constant 0 : index
    %c0_6 = arith.constant 0 : index
    %4 = vector.load %arg3[%c0_4, %c0_5, %c0_6] : memref<15x6x45xbf16, #tpu.memory_space<vmem>>, vector<1x6x45xbf16>
    %5 = vector.shape_cast %4 : vector<1x6x45xbf16> to vector<6x45xbf16>
    %c1_7 = arith.constant 1 : index
    %c0_8 = arith.constant 0 : index
    %c0_9 = arith.constant 0 : index
    %6 = vector.load %arg3[%c1_7, %c0_8, %c0_9] : memref<15x6x45xbf16, #tpu.memory_space<vmem>>, vector<1x6x45xbf16>
    %7 = vector.shape_cast %6 : vector<1x6x45xbf16> to vector<6x45xbf16>
    %c2 = arith.constant 2 : index
    %c0_10 = arith.constant 0 : index
    %c0_11 = arith.constant 0 : index
    %8 = vector.load %arg3[%c2, %c0_10, %c0_11] : memref<15x6x45xbf16, #tpu.memory_space<vmem>>, vector<1x6x45xbf16>
    %9 = vector.shape_cast %8 : vector<1x6x45xbf16> to vector<6x45xbf16>
    %c3 = arith.constant 3 : index
    %c0_12 = arith.constant 0 : index
    %c0_13 = arith.constant 0 : index
    %10 = vector.load %arg3[%c3, %c0_12, %c0_13] : memref<15x6x45xbf16, #tpu.memory_space<vmem>>, vector<1x6x45xbf16>
    %11 = vector.shape_cast %10 : vector<1x6x45xbf16> to vector<6x45xbf16>
    %c4 = arith.constant 4 : index
    %c0_14 = arith.constant 0 : index
    %c0_15 = arith.constant 0 : index
    %12 = vector.load %arg3[%c4, %c0_14, %c0_15] : memref<15x6x45xbf16, #tpu.memory_space<vmem>>, vector<1x6x45xbf16>
    %13 = vector.shape_cast %12 : vector<1x6x45xbf16> to vector<6x45xbf16>
    %c5 = arith.constant 5 : index
    %c0_16 = arith.constant 0 : index
    %c0_17 = arith.constant 0 : index
    %14 = vector.load %arg3[%c5, %c0_16, %c0_17] : memref<15x6x45xbf16, #tpu.memory_space<vmem>>, vector<1x6x45xbf16>
    %15 = vector.shape_cast %14 : vector<1x6x45xbf16> to vector<6x45xbf16>
    %c6 = arith.constant 6 : index
    %c0_18 = arith.constant 0 : index
    %c0_19 = arith.constant 0 : index
    %16 = vector.load %arg3[%c6, %c0_18, %c0_19] : memref<15x6x45xbf16, #tpu.memory_space<vmem>>, vector<1x6x45xbf16>
    %17 = vector.shape_cast %16 : vector<1x6x45xbf16> to vector<6x45xbf16>
    %c7 = arith.constant 7 : index
    %c0_20 = arith.constant 0 : index
    %c0_21 = arith.constant 0 : index
    %18 = vector.load %arg3[%c7, %c0_20, %c0_21] : memref<15x6x45xbf16, #tpu.memory_space<vmem>>, vector<1x6x45xbf16>
    %19 = vector.shape_cast %18 : vector<1x6x45xbf16> to vector<6x45xbf16>
    %c8 = arith.constant 8 : index
    %c0_22 = arith.constant 0 : index
    %c0_23 = arith.constant 0 : index
    %20 = vector.load %arg3[%c8, %c0_22, %c0_23] : memref<15x6x45xbf16, #tpu.memory_space<vmem>>, vector<1x6x45xbf16>
    %21 = vector.shape_cast %20 : vector<1x6x45xbf16> to vector<6x45xbf16>
    %c9 = arith.constant 9 : index
    %c0_24 = arith.constant 0 : index
    %c0_25 = arith.constant 0 : index
    %22 = vector.load %arg3[%c9, %c0_24, %c0_25] : memref<15x6x45xbf16, #tpu.memory_space<vmem>>, vector<1x6x45xbf16>
    %23 = vector.shape_cast %22 : vector<1x6x45xbf16> to vector<6x45xbf16>
    %c10 = arith.constant 10 : index
    %c0_26 = arith.constant 0 : index
    %c0_27 = arith.constant 0 : index
    %24 = vector.load %arg3[%c10, %c0_26, %c0_27] : memref<15x6x45xbf16, #tpu.memory_space<vmem>>, vector<1x6x45xbf16>
    %25 = vector.shape_cast %24 : vector<1x6x45xbf16> to vector<6x45xbf16>
    %c11 = arith.constant 11 : index
    %c0_28 = arith.constant 0 : index
    %c0_29 = arith.constant 0 : index
    %26 = vector.load %arg3[%c11, %c0_28, %c0_29] : memref<15x6x45xbf16, #tpu.memory_space<vmem>>, vector<1x6x45xbf16>
    %27 = vector.shape_cast %26 : vector<1x6x45xbf16> to vector<6x45xbf16>
    %c12 = arith.constant 12 : index
    %c0_30 = arith.constant 0 : index
    %c0_31 = arith.constant 0 : index
    %28 = vector.load %arg3[%c12, %c0_30, %c0_31] : memref<15x6x45xbf16, #tpu.memory_space<vmem>>, vector<1x6x45xbf16>
    %29 = vector.shape_cast %28 : vector<1x6x45xbf16> to vector<6x45xbf16>
    %c13 = arith.constant 13 : index
    %c0_32 = arith.constant 0 : index
    %c0_33 = arith.constant 0 : index
    %30 = vector.load %arg3[%c13, %c0_32, %c0_33] : memref<15x6x45xbf16, #tpu.memory_space<vmem>>, vector<1x6x45xbf16>
    %31 = vector.shape_cast %30 : vector<1x6x45xbf16> to vector<6x45xbf16>
    %c14 = arith.constant 14 : index
    %c0_34 = arith.constant 0 : index
    %c0_35 = arith.constant 0 : index
    %32 = vector.load %arg3[%c14, %c0_34, %c0_35] : memref<15x6x45xbf16, #tpu.memory_space<vmem>>, vector<1x6x45xbf16>
    %33 = vector.shape_cast %32 : vector<1x6x45xbf16> to vector<6x45xbf16>
    %c30_i32 = arith.constant 30 : i32
    %34 = arith.muli %c30_i32, %arg1 : i32
    %c0_i32 = arith.constant 0 : i32
    %c15_i32 = arith.constant 15 : i32
    %35 = arith.addi %c0_i32, %c15_i32 : i32
    %c1_i32 = arith.constant 1 : i32
    scf.for %arg7 = %c0_i32 to %35 step %c1_i32  : i32 {
      %c1_i32_37 = arith.constant 1 : i32
      %36 = arith.muli %arg7, %c1_i32_37 : i32
      %c0_i32_38 = arith.constant 0 : i32
      %37 = arith.addi %c0_i32_38, %36 : i32
      %c2_i32 = arith.constant 2 : i32
      %38 = arith.muli %c2_i32, %37 : i32
      %39 = arith.addi %34, %38 : i32
      %c0_39 = arith.constant 0 : index
      %40 = arith.index_cast %39 : i32 to index
      %c0_40 = arith.constant 0 : index
      %c0_41 = arith.constant 0 : index
      %41 = vector.load %arg2[%c0_39, %40, %c0_40, %c0_41] : memref<1x224x45x210xbf16, #tpu.memory_space<vmem>>, vector<1x1x45x210xbf16>
      %42 = vector.shape_cast %41 : vector<1x1x45x210xbf16> to vector<45x210xbf16>
      %cst = arith.constant dense<0.000000e+00> : vector<6x210xf32>
      %43 = tpu.matmul %5, %42, %cst {dimension_numbers = #tpu.dot_dimension_numbers<[1], [0], [0], [1], [0, 0, 1, 1], [], []>} : vector<6x45xbf16>, vector<45x210xbf16>, vector<6x210xf32> -> vector<6x210xf32>
      %c1_i32_42 = arith.constant 1 : i32
      %44 = arith.addi %39, %c1_i32_42 : i32
      %c0_43 = arith.constant 0 : index
      %45 = arith.index_cast %44 : i32 to index
      %c0_44 = arith.constant 0 : index
      %c0_45 = arith.constant 0 : index
      %46 = vector.load %arg2[%c0_43, %45, %c0_44, %c0_45] : memref<1x224x45x210xbf16, #tpu.memory_space<vmem>>, vector<1x1x45x210xbf16>
      %47 = vector.shape_cast %46 : vector<1x1x45x210xbf16> to vector<45x210xbf16>
      %cst_46 = arith.constant dense<0.000000e+00> : vector<6x210xf32>
      %48 = tpu.matmul %5, %47, %cst_46 {dimension_numbers = #tpu.dot_dimension_numbers<[1], [0], [0], [1], [0, 0, 1, 1], [], []>} : vector<6x45xbf16>, vector<45x210xbf16>, vector<6x210xf32> -> vector<6x210xf32>
      %c1_i32_47 = arith.constant 1 : i32
      %49 = arith.addi %39, %c1_i32_47 : i32
      %c0_48 = arith.constant 0 : index
      %50 = arith.index_cast %49 : i32 to index
      %c0_49 = arith.constant 0 : index
      %c0_50 = arith.constant 0 : index
      %51 = vector.load %arg2[%c0_48, %50, %c0_49, %c0_50] : memref<1x224x45x210xbf16, #tpu.memory_space<vmem>>, vector<1x1x45x210xbf16>
      %52 = vector.shape_cast %51 : vector<1x1x45x210xbf16> to vector<45x210xbf16>
      %cst_51 = arith.constant dense<0.000000e+00> : vector<6x210xf32>
      %53 = tpu.matmul %7, %52, %cst_51 {dimension_numbers = #tpu.dot_dimension_numbers<[1], [0], [0], [1], [0, 0, 1, 1], [], []>} : vector<6x45xbf16>, vector<45x210xbf16>, vector<6x210xf32> -> vector<6x210xf32>
      %54 = arith.addf %43, %53 : vector<6x210xf32>
      %c1_i32_52 = arith.constant 1 : i32
      %55 = arith.addi %39, %c1_i32_52 : i32
      %c1_i32_53 = arith.constant 1 : i32
      %56 = arith.addi %55, %c1_i32_53 : i32
      %c0_54 = arith.constant 0 : index
      %57 = arith.index_cast %56 : i32 to index
      %c0_55 = arith.constant 0 : index
      %c0_56 = arith.constant 0 : index
      %58 = vector.load %arg2[%c0_54, %57, %c0_55, %c0_56] : memref<1x224x45x210xbf16, #tpu.memory_space<vmem>>, vector<1x1x45x210xbf16>
      %59 = vector.shape_cast %58 : vector<1x1x45x210xbf16> to vector<45x210xbf16>
      %cst_57 = arith.constant dense<0.000000e+00> : vector<6x210xf32>
      %60 = tpu.matmul %7, %59, %cst_57 {dimension_numbers = #tpu.dot_dimension_numbers<[1], [0], [0], [1], [0, 0, 1, 1], [], []>} : vector<6x45xbf16>, vector<45x210xbf16>, vector<6x210xf32> -> vector<6x210xf32>
      %61 = arith.addf %48, %60 : vector<6x210xf32>
      %c2_i32_58 = arith.constant 2 : i32
      %62 = arith.addi %39, %c2_i32_58 : i32
      %c0_59 = arith.constant 0 : index
      %63 = arith.index_cast %62 : i32 to index
      %c0_60 = arith.constant 0 : index
      %c0_61 = arith.constant 0 : index
      %64 = vector.load %arg2[%c0_59, %63, %c0_60, %c0_61] : memref<1x224x45x210xbf16, #tpu.memory_space<vmem>>, vector<1x1x45x210xbf16>
      %65 = vector.shape_cast %64 : vector<1x1x45x210xbf16> to vector<45x210xbf16>
      %cst_62 = arith.constant dense<0.000000e+00> : vector<6x210xf32>
      %66 = tpu.matmul %9, %65, %cst_62 {dimension_numbers = #tpu.dot_dimension_numbers<[1], [0], [0], [1], [0, 0, 1, 1], [], []>} : vector<6x45xbf16>, vector<45x210xbf16>, vector<6x210xf32> -> vector<6x210xf32>
      %67 = arith.addf %54, %66 : vector<6x210xf32>
      %c2_i32_63 = arith.constant 2 : i32
      %68 = arith.addi %39, %c2_i32_63 : i32
      %c1_i32_64 = arith.constant 1 : i32
      %69 = arith.addi %68, %c1_i32_64 : i32
      %c0_65 = arith.constant 0 : index
      %70 = arith.index_cast %69 : i32 to index
      %c0_66 = arith.constant 0 : index
      %c0_67 = arith.constant 0 : index
      %71 = vector.load %arg2[%c0_65, %70, %c0_66, %c0_67] : memref<1x224x45x210xbf16, #tpu.memory_space<vmem>>, vector<1x1x45x210xbf16>
      %72 = vector.shape_cast %71 : vector<1x1x45x210xbf16> to vector<45x210xbf16>
      %cst_68 = arith.constant dense<0.000000e+00> : vector<6x210xf32>
      %73 = tpu.matmul %9, %72, %cst_68 {dimension_numbers = #tpu.dot_dimension_numbers<[1], [0], [0], [1], [0, 0, 1, 1], [], []>} : vector<6x45xbf16>, vector<45x210xbf16>, vector<6x210xf32> -> vector<6x210xf32>
      %74 = arith.addf %61, %73 : vector<6x210xf32>
      %c3_i32 = arith.constant 3 : i32
      %75 = arith.addi %39, %c3_i32 : i32
      %c0_69 = arith.constant 0 : index
      %76 = arith.index_cast %75 : i32 to index
      %c0_70 = arith.constant 0 : index
      %c0_71 = arith.constant 0 : index
      %77 = vector.load %arg2[%c0_69, %76, %c0_70, %c0_71] : memref<1x224x45x210xbf16, #tpu.memory_space<vmem>>, vector<1x1x45x210xbf16>
      %78 = vector.shape_cast %77 : vector<1x1x45x210xbf16> to vector<45x210xbf16>
      %cst_72 = arith.constant dense<0.000000e+00> : vector<6x210xf32>
      %79 = tpu.matmul %11, %78, %cst_72 {dimension_numbers = #tpu.dot_dimension_numbers<[1], [0], [0], [1], [0, 0, 1, 1], [], []>} : vector<6x45xbf16>, vector<45x210xbf16>, vector<6x210xf32> -> vector<6x210xf32>
      %80 = arith.addf %67, %79 : vector<6x210xf32>
      %c3_i32_73 = arith.constant 3 : i32
      %81 = arith.addi %39, %c3_i32_73 : i32
      %c1_i32_74 = arith.constant 1 : i32
      %82 = arith.addi %81, %c1_i32_74 : i32
      %c0_75 = arith.constant 0 : index
      %83 = arith.index_cast %82 : i32 to index
      %c0_76 = arith.constant 0 : index
      %c0_77 = arith.constant 0 : index
      %84 = vector.load %arg2[%c0_75, %83, %c0_76, %c0_77] : memref<1x224x45x210xbf16, #tpu.memory_space<vmem>>, vector<1x1x45x210xbf16>
      %85 = vector.shape_cast %84 : vector<1x1x45x210xbf16> to vector<45x210xbf16>
      %cst_78 = arith.constant dense<0.000000e+00> : vector<6x210xf32>
      %86 = tpu.matmul %11, %85, %cst_78 {dimension_numbers = #tpu.dot_dimension_numbers<[1], [0], [0], [1], [0, 0, 1, 1], [], []>} : vector<6x45xbf16>, vector<45x210xbf16>, vector<6x210xf32> -> vector<6x210xf32>
      %87 = arith.addf %74, %86 : vector<6x210xf32>
      %c4_i32 = arith.constant 4 : i32
      %88 = arith.addi %39, %c4_i32 : i32
      %c0_79 = arith.constant 0 : index
      %89 = arith.index_cast %88 : i32 to index
      %c0_80 = arith.constant 0 : index
      %c0_81 = arith.constant 0 : index
      %90 = vector.load %arg2[%c0_79, %89, %c0_80, %c0_81] : memref<1x224x45x210xbf16, #tpu.memory_space<vmem>>, vector<1x1x45x210xbf16>
      %91 = vector.shape_cast %90 : vector<1x1x45x210xbf16> to vector<45x210xbf16>
      %cst_82 = arith.constant dense<0.000000e+00> : vector<6x210xf32>
      %92 = tpu.matmul %13, %91, %cst_82 {dimension_numbers = #tpu.dot_dimension_numbers<[1], [0], [0], [1], [0, 0, 1, 1], [], []>} : vector<6x45xbf16>, vector<45x210xbf16>, vector<6x210xf32> -> vector<6x210xf32>
      %93 = arith.addf %80, %92 : vector<6x210xf32>
      %c4_i32_83 = arith.constant 4 : i32
      %94 = arith.addi %39, %c4_i32_83 : i32
      %c1_i32_84 = arith.constant 1 : i32
      %95 = arith.addi %94, %c1_i32_84 : i32
      %c0_85 = arith.constant 0 : index
      %96 = arith.index_cast %95 : i32 to index
      %c0_86 = arith.constant 0 : index
      %c0_87 = arith.constant 0 : index
      %97 = vector.load %arg2[%c0_85, %96, %c0_86, %c0_87] : memref<1x224x45x210xbf16, #tpu.memory_space<vmem>>, vector<1x1x45x210xbf16>
      %98 = vector.shape_cast %97 : vector<1x1x45x210xbf16> to vector<45x210xbf16>
      %cst_88 = arith.constant dense<0.000000e+00> : vector<6x210xf32>
      %99 = tpu.matmul %13, %98, %cst_88 {dimension_numbers = #tpu.dot_dimension_numbers<[1], [0], [0], [1], [0, 0, 1, 1], [], []>} : vector<6x45xbf16>, vector<45x210xbf16>, vector<6x210xf32> -> vector<6x210xf32>
      %100 = arith.addf %87, %99 : vector<6x210xf32>
      %c5_i32 = arith.constant 5 : i32
      %101 = arith.addi %39, %c5_i32 : i32
      %c0_89 = arith.constant 0 : index
      %102 = arith.index_cast %101 : i32 to index
      %c0_90 = arith.constant 0 : index
      %c0_91 = arith.constant 0 : index
      %103 = vector.load %arg2[%c0_89, %102, %c0_90, %c0_91] : memref<1x224x45x210xbf16, #tpu.memory_space<vmem>>, vector<1x1x45x210xbf16>
      %104 = vector.shape_cast %103 : vector<1x1x45x210xbf16> to vector<45x210xbf16>
      %cst_92 = arith.constant dense<0.000000e+00> : vector<6x210xf32>
      %105 = tpu.matmul %15, %104, %cst_92 {dimension_numbers = #tpu.dot_dimension_numbers<[1], [0], [0], [1], [0, 0, 1, 1], [], []>} : vector<6x45xbf16>, vector<45x210xbf16>, vector<6x210xf32> -> vector<6x210xf32>
      %106 = arith.addf %93, %105 : vector<6x210xf32>
      %c5_i32_93 = arith.constant 5 : i32
      %107 = arith.addi %39, %c5_i32_93 : i32
      %c1_i32_94 = arith.constant 1 : i32
      %108 = arith.addi %107, %c1_i32_94 : i32
      %c0_95 = arith.constant 0 : index
      %109 = arith.index_cast %108 : i32 to index
      %c0_96 = arith.constant 0 : index
      %c0_97 = arith.constant 0 : index
      %110 = vector.load %arg2[%c0_95, %109, %c0_96, %c0_97] : memref<1x224x45x210xbf16, #tpu.memory_space<vmem>>, vector<1x1x45x210xbf16>
      %111 = vector.shape_cast %110 : vector<1x1x45x210xbf16> to vector<45x210xbf16>
      %cst_98 = arith.constant dense<0.000000e+00> : vector<6x210xf32>
      %112 = tpu.matmul %15, %111, %cst_98 {dimension_numbers = #tpu.dot_dimension_numbers<[1], [0], [0], [1], [0, 0, 1, 1], [], []>} : vector<6x45xbf16>, vector<45x210xbf16>, vector<6x210xf32> -> vector<6x210xf32>
      %113 = arith.addf %100, %112 : vector<6x210xf32>
      %c6_i32 = arith.constant 6 : i32
      %114 = arith.addi %39, %c6_i32 : i32
      %c0_99 = arith.constant 0 : index
      %115 = arith.index_cast %114 : i32 to index
      %c0_100 = arith.constant 0 : index
      %c0_101 = arith.constant 0 : index
      %116 = vector.load %arg2[%c0_99, %115, %c0_100, %c0_101] : memref<1x224x45x210xbf16, #tpu.memory_space<vmem>>, vector<1x1x45x210xbf16>
      %117 = vector.shape_cast %116 : vector<1x1x45x210xbf16> to vector<45x210xbf16>
      %cst_102 = arith.constant dense<0.000000e+00> : vector<6x210xf32>
      %118 = tpu.matmul %17, %117, %cst_102 {dimension_numbers = #tpu.dot_dimension_numbers<[1], [0], [0], [1], [0, 0, 1, 1], [], []>} : vector<6x45xbf16>, vector<45x210xbf16>, vector<6x210xf32> -> vector<6x210xf32>
      %119 = arith.addf %106, %118 : vector<6x210xf32>
      %c6_i32_103 = arith.constant 6 : i32
      %120 = arith.addi %39, %c6_i32_103 : i32
      %c1_i32_104 = arith.constant 1 : i32
      %121 = arith.addi %120, %c1_i32_104 : i32
      %c0_105 = arith.constant 0 : index
      %122 = arith.index_cast %121 : i32 to index
      %c0_106 = arith.constant 0 : index
      %c0_107 = arith.constant 0 : index
      %123 = vector.load %arg2[%c0_105, %122, %c0_106, %c0_107] : memref<1x224x45x210xbf16, #tpu.memory_space<vmem>>, vector<1x1x45x210xbf16>
      %124 = vector.shape_cast %123 : vector<1x1x45x210xbf16> to vector<45x210xbf16>
      %cst_108 = arith.constant dense<0.000000e+00> : vector<6x210xf32>
      %125 = tpu.matmul %17, %124, %cst_108 {dimension_numbers = #tpu.dot_dimension_numbers<[1], [0], [0], [1], [0, 0, 1, 1], [], []>} : vector<6x45xbf16>, vector<45x210xbf16>, vector<6x210xf32> -> vector<6x210xf32>
      %126 = arith.addf %113, %125 : vector<6x210xf32>
      %c7_i32 = arith.constant 7 : i32
      %127 = arith.addi %39, %c7_i32 : i32
      %c0_109 = arith.constant 0 : index
      %128 = arith.index_cast %127 : i32 to index
      %c0_110 = arith.constant 0 : index
      %c0_111 = arith.constant 0 : index
      %129 = vector.load %arg2[%c0_109, %128, %c0_110, %c0_111] : memref<1x224x45x210xbf16, #tpu.memory_space<vmem>>, vector<1x1x45x210xbf16>
      %130 = vector.shape_cast %129 : vector<1x1x45x210xbf16> to vector<45x210xbf16>
      %cst_112 = arith.constant dense<0.000000e+00> : vector<6x210xf32>
      %131 = tpu.matmul %19, %130, %cst_112 {dimension_numbers = #tpu.dot_dimension_numbers<[1], [0], [0], [1], [0, 0, 1, 1], [], []>} : vector<6x45xbf16>, vector<45x210xbf16>, vector<6x210xf32> -> vector<6x210xf32>
      %132 = arith.addf %119, %131 : vector<6x210xf32>
      %c7_i32_113 = arith.constant 7 : i32
      %133 = arith.addi %39, %c7_i32_113 : i32
      %c1_i32_114 = arith.constant 1 : i32
      %134 = arith.addi %133, %c1_i32_114 : i32
      %c0_115 = arith.constant 0 : index
      %135 = arith.index_cast %134 : i32 to index
      %c0_116 = arith.constant 0 : index
      %c0_117 = arith.constant 0 : index
      %136 = vector.load %arg2[%c0_115, %135, %c0_116, %c0_117] : memref<1x224x45x210xbf16, #tpu.memory_space<vmem>>, vector<1x1x45x210xbf16>
      %137 = vector.shape_cast %136 : vector<1x1x45x210xbf16> to vector<45x210xbf16>
      %cst_118 = arith.constant dense<0.000000e+00> : vector<6x210xf32>
      %138 = tpu.matmul %19, %137, %cst_118 {dimension_numbers = #tpu.dot_dimension_numbers<[1], [0], [0], [1], [0, 0, 1, 1], [], []>} : vector<6x45xbf16>, vector<45x210xbf16>, vector<6x210xf32> -> vector<6x210xf32>
      %139 = arith.addf %126, %138 : vector<6x210xf32>
      %c8_i32 = arith.constant 8 : i32
      %140 = arith.addi %39, %c8_i32 : i32
      %c0_119 = arith.constant 0 : index
      %141 = arith.index_cast %140 : i32 to index
      %c0_120 = arith.constant 0 : index
      %c0_121 = arith.constant 0 : index
      %142 = vector.load %arg2[%c0_119, %141, %c0_120, %c0_121] : memref<1x224x45x210xbf16, #tpu.memory_space<vmem>>, vector<1x1x45x210xbf16>
      %143 = vector.shape_cast %142 : vector<1x1x45x210xbf16> to vector<45x210xbf16>
      %cst_122 = arith.constant dense<0.000000e+00> : vector<6x210xf32>
      %144 = tpu.matmul %21, %143, %cst_122 {dimension_numbers = #tpu.dot_dimension_numbers<[1], [0], [0], [1], [0, 0, 1, 1], [], []>} : vector<6x45xbf16>, vector<45x210xbf16>, vector<6x210xf32> -> vector<6x210xf32>
      %145 = arith.addf %132, %144 : vector<6x210xf32>
      %c8_i32_123 = arith.constant 8 : i32
      %146 = arith.addi %39, %c8_i32_123 : i32
      %c1_i32_124 = arith.constant 1 : i32
      %147 = arith.addi %146, %c1_i32_124 : i32
      %c0_125 = arith.constant 0 : index
      %148 = arith.index_cast %147 : i32 to index
      %c0_126 = arith.constant 0 : index
      %c0_127 = arith.constant 0 : index
      %149 = vector.load %arg2[%c0_125, %148, %c0_126, %c0_127] : memref<1x224x45x210xbf16, #tpu.memory_space<vmem>>, vector<1x1x45x210xbf16>
      %150 = vector.shape_cast %149 : vector<1x1x45x210xbf16> to vector<45x210xbf16>
      %cst_128 = arith.constant dense<0.000000e+00> : vector<6x210xf32>
      %151 = tpu.matmul %21, %150, %cst_128 {dimension_numbers = #tpu.dot_dimension_numbers<[1], [0], [0], [1], [0, 0, 1, 1], [], []>} : vector<6x45xbf16>, vector<45x210xbf16>, vector<6x210xf32> -> vector<6x210xf32>
      %152 = arith.addf %139, %151 : vector<6x210xf32>
      %c9_i32 = arith.constant 9 : i32
      %153 = arith.addi %39, %c9_i32 : i32
      %c0_129 = arith.constant 0 : index
      %154 = arith.index_cast %153 : i32 to index
      %c0_130 = arith.constant 0 : index
      %c0_131 = arith.constant 0 : index
      %155 = vector.load %arg2[%c0_129, %154, %c0_130, %c0_131] : memref<1x224x45x210xbf16, #tpu.memory_space<vmem>>, vector<1x1x45x210xbf16>
      %156 = vector.shape_cast %155 : vector<1x1x45x210xbf16> to vector<45x210xbf16>
      %cst_132 = arith.constant dense<0.000000e+00> : vector<6x210xf32>
      %157 = tpu.matmul %23, %156, %cst_132 {dimension_numbers = #tpu.dot_dimension_numbers<[1], [0], [0], [1], [0, 0, 1, 1], [], []>} : vector<6x45xbf16>, vector<45x210xbf16>, vector<6x210xf32> -> vector<6x210xf32>
      %158 = arith.addf %145, %157 : vector<6x210xf32>
      %c9_i32_133 = arith.constant 9 : i32
      %159 = arith.addi %39, %c9_i32_133 : i32
      %c1_i32_134 = arith.constant 1 : i32
      %160 = arith.addi %159, %c1_i32_134 : i32
      %c0_135 = arith.constant 0 : index
      %161 = arith.index_cast %160 : i32 to index
      %c0_136 = arith.constant 0 : index
      %c0_137 = arith.constant 0 : index
      %162 = vector.load %arg2[%c0_135, %161, %c0_136, %c0_137] : memref<1x224x45x210xbf16, #tpu.memory_space<vmem>>, vector<1x1x45x210xbf16>
      %163 = vector.shape_cast %162 : vector<1x1x45x210xbf16> to vector<45x210xbf16>
      %cst_138 = arith.constant dense<0.000000e+00> : vector<6x210xf32>
      %164 = tpu.matmul %23, %163, %cst_138 {dimension_numbers = #tpu.dot_dimension_numbers<[1], [0], [0], [1], [0, 0, 1, 1], [], []>} : vector<6x45xbf16>, vector<45x210xbf16>, vector<6x210xf32> -> vector<6x210xf32>
      %165 = arith.addf %152, %164 : vector<6x210xf32>
      %c10_i32 = arith.constant 10 : i32
      %166 = arith.addi %39, %c10_i32 : i32
      %c0_139 = arith.constant 0 : index
      %167 = arith.index_cast %166 : i32 to index
      %c0_140 = arith.constant 0 : index
      %c0_141 = arith.constant 0 : index
      %168 = vector.load %arg2[%c0_139, %167, %c0_140, %c0_141] : memref<1x224x45x210xbf16, #tpu.memory_space<vmem>>, vector<1x1x45x210xbf16>
      %169 = vector.shape_cast %168 : vector<1x1x45x210xbf16> to vector<45x210xbf16>
      %cst_142 = arith.constant dense<0.000000e+00> : vector<6x210xf32>
      %170 = tpu.matmul %25, %169, %cst_142 {dimension_numbers = #tpu.dot_dimension_numbers<[1], [0], [0], [1], [0, 0, 1, 1], [], []>} : vector<6x45xbf16>, vector<45x210xbf16>, vector<6x210xf32> -> vector<6x210xf32>
      %171 = arith.addf %158, %170 : vector<6x210xf32>
      %c10_i32_143 = arith.constant 10 : i32
      %172 = arith.addi %39, %c10_i32_143 : i32
      %c1_i32_144 = arith.constant 1 : i32
      %173 = arith.addi %172, %c1_i32_144 : i32
      %c0_145 = arith.constant 0 : index
      %174 = arith.index_cast %173 : i32 to index
      %c0_146 = arith.constant 0 : index
      %c0_147 = arith.constant 0 : index
      %175 = vector.load %arg2[%c0_145, %174, %c0_146, %c0_147] : memref<1x224x45x210xbf16, #tpu.memory_space<vmem>>, vector<1x1x45x210xbf16>
      %176 = vector.shape_cast %175 : vector<1x1x45x210xbf16> to vector<45x210xbf16>
      %cst_148 = arith.constant dense<0.000000e+00> : vector<6x210xf32>
      %177 = tpu.matmul %25, %176, %cst_148 {dimension_numbers = #tpu.dot_dimension_numbers<[1], [0], [0], [1], [0, 0, 1, 1], [], []>} : vector<6x45xbf16>, vector<45x210xbf16>, vector<6x210xf32> -> vector<6x210xf32>
      %178 = arith.addf %165, %177 : vector<6x210xf32>
      %c11_i32 = arith.constant 11 : i32
      %179 = arith.addi %39, %c11_i32 : i32
      %c0_149 = arith.constant 0 : index
      %180 = arith.index_cast %179 : i32 to index
      %c0_150 = arith.constant 0 : index
      %c0_151 = arith.constant 0 : index
      %181 = vector.load %arg2[%c0_149, %180, %c0_150, %c0_151] : memref<1x224x45x210xbf16, #tpu.memory_space<vmem>>, vector<1x1x45x210xbf16>
      %182 = vector.shape_cast %181 : vector<1x1x45x210xbf16> to vector<45x210xbf16>
      %cst_152 = arith.constant dense<0.000000e+00> : vector<6x210xf32>
      %183 = tpu.matmul %27, %182, %cst_152 {dimension_numbers = #tpu.dot_dimension_numbers<[1], [0], [0], [1], [0, 0, 1, 1], [], []>} : vector<6x45xbf16>, vector<45x210xbf16>, vector<6x210xf32> -> vector<6x210xf32>
      %184 = arith.addf %171, %183 : vector<6x210xf32>
      %c11_i32_153 = arith.constant 11 : i32
      %185 = arith.addi %39, %c11_i32_153 : i32
      %c1_i32_154 = arith.constant 1 : i32
      %186 = arith.addi %185, %c1_i32_154 : i32
      %c0_155 = arith.constant 0 : index
      %187 = arith.index_cast %186 : i32 to index
      %c0_156 = arith.constant 0 : index
      %c0_157 = arith.constant 0 : index
      %188 = vector.load %arg2[%c0_155, %187, %c0_156, %c0_157] : memref<1x224x45x210xbf16, #tpu.memory_space<vmem>>, vector<1x1x45x210xbf16>
      %189 = vector.shape_cast %188 : vector<1x1x45x210xbf16> to vector<45x210xbf16>
      %cst_158 = arith.constant dense<0.000000e+00> : vector<6x210xf32>
      %190 = tpu.matmul %27, %189, %cst_158 {dimension_numbers = #tpu.dot_dimension_numbers<[1], [0], [0], [1], [0, 0, 1, 1], [], []>} : vector<6x45xbf16>, vector<45x210xbf16>, vector<6x210xf32> -> vector<6x210xf32>
      %191 = arith.addf %178, %190 : vector<6x210xf32>
      %c12_i32 = arith.constant 12 : i32
      %192 = arith.addi %39, %c12_i32 : i32
      %c0_159 = arith.constant 0 : index
      %193 = arith.index_cast %192 : i32 to index
      %c0_160 = arith.constant 0 : index
      %c0_161 = arith.constant 0 : index
      %194 = vector.load %arg2[%c0_159, %193, %c0_160, %c0_161] : memref<1x224x45x210xbf16, #tpu.memory_space<vmem>>, vector<1x1x45x210xbf16>
      %195 = vector.shape_cast %194 : vector<1x1x45x210xbf16> to vector<45x210xbf16>
      %cst_162 = arith.constant dense<0.000000e+00> : vector<6x210xf32>
      %196 = tpu.matmul %29, %195, %cst_162 {dimension_numbers = #tpu.dot_dimension_numbers<[1], [0], [0], [1], [0, 0, 1, 1], [], []>} : vector<6x45xbf16>, vector<45x210xbf16>, vector<6x210xf32> -> vector<6x210xf32>
      %197 = arith.addf %184, %196 : vector<6x210xf32>
      %c12_i32_163 = arith.constant 12 : i32
      %198 = arith.addi %39, %c12_i32_163 : i32
      %c1_i32_164 = arith.constant 1 : i32
      %199 = arith.addi %198, %c1_i32_164 : i32
      %c0_165 = arith.constant 0 : index
      %200 = arith.index_cast %199 : i32 to index
      %c0_166 = arith.constant 0 : index
      %c0_167 = arith.constant 0 : index
      %201 = vector.load %arg2[%c0_165, %200, %c0_166, %c0_167] : memref<1x224x45x210xbf16, #tpu.memory_space<vmem>>, vector<1x1x45x210xbf16>
      %202 = vector.shape_cast %201 : vector<1x1x45x210xbf16> to vector<45x210xbf16>
      %cst_168 = arith.constant dense<0.000000e+00> : vector<6x210xf32>
      %203 = tpu.matmul %29, %202, %cst_168 {dimension_numbers = #tpu.dot_dimension_numbers<[1], [0], [0], [1], [0, 0, 1, 1], [], []>} : vector<6x45xbf16>, vector<45x210xbf16>, vector<6x210xf32> -> vector<6x210xf32>
      %204 = arith.addf %191, %203 : vector<6x210xf32>
      %c13_i32 = arith.constant 13 : i32
      %205 = arith.addi %39, %c13_i32 : i32
      %c0_169 = arith.constant 0 : index
      %206 = arith.index_cast %205 : i32 to index
      %c0_170 = arith.constant 0 : index
      %c0_171 = arith.constant 0 : index
      %207 = vector.load %arg2[%c0_169, %206, %c0_170, %c0_171] : memref<1x224x45x210xbf16, #tpu.memory_space<vmem>>, vector<1x1x45x210xbf16>
      %208 = vector.shape_cast %207 : vector<1x1x45x210xbf16> to vector<45x210xbf16>
      %cst_172 = arith.constant dense<0.000000e+00> : vector<6x210xf32>
      %209 = tpu.matmul %31, %208, %cst_172 {dimension_numbers = #tpu.dot_dimension_numbers<[1], [0], [0], [1], [0, 0, 1, 1], [], []>} : vector<6x45xbf16>, vector<45x210xbf16>, vector<6x210xf32> -> vector<6x210xf32>
      %210 = arith.addf %197, %209 : vector<6x210xf32>
      %c13_i32_173 = arith.constant 13 : i32
      %211 = arith.addi %39, %c13_i32_173 : i32
      %c1_i32_174 = arith.constant 1 : i32
      %212 = arith.addi %211, %c1_i32_174 : i32
      %c0_175 = arith.constant 0 : index
      %213 = arith.index_cast %212 : i32 to index
      %c0_176 = arith.constant 0 : index
      %c0_177 = arith.constant 0 : index
      %214 = vector.load %arg2[%c0_175, %213, %c0_176, %c0_177] : memref<1x224x45x210xbf16, #tpu.memory_space<vmem>>, vector<1x1x45x210xbf16>
      %215 = vector.shape_cast %214 : vector<1x1x45x210xbf16> to vector<45x210xbf16>
      %cst_178 = arith.constant dense<0.000000e+00> : vector<6x210xf32>
      %216 = tpu.matmul %31, %215, %cst_178 {dimension_numbers = #tpu.dot_dimension_numbers<[1], [0], [0], [1], [0, 0, 1, 1], [], []>} : vector<6x45xbf16>, vector<45x210xbf16>, vector<6x210xf32> -> vector<6x210xf32>
      %217 = arith.addf %204, %216 : vector<6x210xf32>
      %c14_i32 = arith.constant 14 : i32
      %218 = arith.addi %39, %c14_i32 : i32
      %c0_179 = arith.constant 0 : index
      %219 = arith.index_cast %218 : i32 to index
      %c0_180 = arith.constant 0 : index
      %c0_181 = arith.constant 0 : index
      %220 = vector.load %arg2[%c0_179, %219, %c0_180, %c0_181] : memref<1x224x45x210xbf16, #tpu.memory_space<vmem>>, vector<1x1x45x210xbf16>
      %221 = vector.shape_cast %220 : vector<1x1x45x210xbf16> to vector<45x210xbf16>
      %cst_182 = arith.constant dense<0.000000e+00> : vector<6x210xf32>
      %222 = tpu.matmul %33, %221, %cst_182 {dimension_numbers = #tpu.dot_dimension_numbers<[1], [0], [0], [1], [0, 0, 1, 1], [], []>} : vector<6x45xbf16>, vector<45x210xbf16>, vector<6x210xf32> -> vector<6x210xf32>
      %223 = arith.addf %210, %222 : vector<6x210xf32>
      %c14_i32_183 = arith.constant 14 : i32
      %224 = arith.addi %39, %c14_i32_183 : i32
      %c1_i32_184 = arith.constant 1 : i32
      %225 = arith.addi %224, %c1_i32_184 : i32
      %c0_185 = arith.constant 0 : index
      %226 = arith.index_cast %225 : i32 to index
      %c0_186 = arith.constant 0 : index
      %c0_187 = arith.constant 0 : index
      %227 = vector.load %arg2[%c0_185, %226, %c0_186, %c0_187] : memref<1x224x45x210xbf16, #tpu.memory_space<vmem>>, vector<1x1x45x210xbf16>
      %228 = vector.shape_cast %227 : vector<1x1x45x210xbf16> to vector<45x210xbf16>
      %cst_188 = arith.constant dense<0.000000e+00> : vector<6x210xf32>
      %229 = tpu.matmul %33, %228, %cst_188 {dimension_numbers = #tpu.dot_dimension_numbers<[1], [0], [0], [1], [0, 0, 1, 1], [], []>} : vector<6x45xbf16>, vector<45x210xbf16>, vector<6x210xf32> -> vector<6x210xf32>
      %230 = arith.addf %217, %229 : vector<6x210xf32>
      %cst_189 = arith.constant 0.000000e+00 : f32
      %231 = vector.broadcast %cst_189 : f32 to vector<6x210xf32>
      %232 = arith.maximumf %223, %231 : vector<6x210xf32>
      %233 = vector.broadcast %1 : vector<6x1xf32> to vector<6x210xf32>
      %234 = arith.mulf %232, %233 : vector<6x210xf32>
      %235 = vector.broadcast %3 : vector<6x1xf32> to vector<6x210xf32>
      %236 = arith.addf %234, %235 : vector<6x210xf32>
      %cst_190 = arith.constant 0.000000e+00 : f32
      %237 = vector.broadcast %cst_190 : f32 to vector<6x210xf32>
      %238 = arith.maximumf %230, %237 : vector<6x210xf32>
      %239 = vector.broadcast %1 : vector<6x1xf32> to vector<6x210xf32>
      %240 = arith.mulf %238, %239 : vector<6x210xf32>
      %241 = vector.broadcast %3 : vector<6x1xf32> to vector<6x210xf32>
      %242 = arith.addf %240, %241 : vector<6x210xf32>
      %243 = arith.maximumf %236, %242 : vector<6x210xf32>
      %244 = arith.truncf %243 : vector<6x210xf32> to vector<6x210xbf16>
      %c0_191 = arith.constant 0 : index
      %c0_192 = arith.constant 0 : index
      %c0_193 = arith.constant 0 : index
      %245 = vector.load %arg5[%c0_191, %c0_192, %c0_193] : memref<2x210x105xbf16, #tpu.memory_space<vmem>>, vector<1x210x105xbf16>
      %246 = vector.shape_cast %245 : vector<1x210x105xbf16> to vector<210x105xbf16>
      %cst_194 = arith.constant dense<0.000000e+00> : vector<6x105xf32>
      %247 = tpu.matmul %244, %246, %cst_194 {dimension_numbers = #tpu.dot_dimension_numbers<[1], [0], [0], [1], [0, 0, 1, 1], [], []>} : vector<6x210xbf16>, vector<210x105xbf16>, vector<6x105xf32> -> vector<6x105xf32>
      %c1_195 = arith.constant 1 : index
      %c0_196 = arith.constant 0 : index
      %c0_197 = arith.constant 0 : index
      %248 = vector.load %arg5[%c1_195, %c0_196, %c0_197] : memref<2x210x105xbf16, #tpu.memory_space<vmem>>, vector<1x210x105xbf16>
      %249 = vector.shape_cast %248 : vector<1x210x105xbf16> to vector<210x105xbf16>
      %cst_198 = arith.constant dense<0.000000e+00> : vector<6x105xf32>
      %250 = tpu.matmul %244, %249, %cst_198 {dimension_numbers = #tpu.dot_dimension_numbers<[1], [0], [0], [1], [0, 0, 1, 1], [], []>} : vector<6x210xbf16>, vector<210x105xbf16>, vector<6x105xf32> -> vector<6x105xf32>
      %251 = arith.maximumf %247, %250 : vector<6x105xf32>
      %252 = arith.truncf %251 : vector<6x105xf32> to vector<6x105xbf16>
      %c0_199 = arith.constant 0 : index
      %253 = arith.index_cast %37 : i32 to index
      %c0_200 = arith.constant 0 : index
      %c0_201 = arith.constant 0 : index
      %254 = vector.load %arg6[%c0_199, %253, %c0_200, %c0_201] : memref<1x15x6x105xbf16, #tpu.memory_space<vmem>>, vector<1x1x6x105xbf16>
      %255 = vector.shape_cast %254 : vector<1x1x6x105xbf16> to vector<6x105xbf16>
      %256 = vector.shape_cast %252 : vector<6x105xbf16> to vector<1x1x6x105xbf16>
      tpu.vector_store %arg6[%c0_199, %253, %c0_200, %c0_201], %256 {strides = array<i32>} : memref<1x15x6x105xbf16, #tpu.memory_space<vmem>>, vector<1x1x6x105xbf16>,
    }
    %c15_i32_36 = arith.constant 15 : i32
    return
  }
  func.func @transform_0(%arg0: i32, %arg1: i32) -> (i32, i32, i32, i32) {
    %c0_i32 = arith.constant 0 : i32
    %c0_i32_0 = arith.constant 0 : i32
    %c0_i32_1 = arith.constant 0 : i32
    %c0_i32_2 = arith.constant 0 : i32
    return %arg0, %c0_i32, %c0_i32_0, %c0_i32_1 : i32, i32, i32, i32
  }
  func.func @transform_1(%arg0: i32, %arg1: i32) -> (i32, i32, i32) {
    %c0_i32 = arith.constant 0 : i32
    %c0_i32_0 = arith.constant 0 : i32
    %c0_i32_1 = arith.constant 0 : i32
    %c0_i32_2 = arith.constant 0 : i32
    return %c0_i32, %c0_i32_0, %c0_i32_1 : i32, i32, i32
  }
  func.func @transform_2(%arg0: i32, %arg1: i32) -> (i32, i32, i32) {
    %c0_i32 = arith.constant 0 : i32
    %c0_i32_0 = arith.constant 0 : i32
    %c0_i32_1 = arith.constant 0 : i32
    %c0_i32_2 = arith.constant 0 : i32
    return %c0_i32, %c0_i32_0, %c0_i32_1 : i32, i32, i32
  }
  func.func @transform_3(%arg0: i32, %arg1: i32) -> (i32, i32, i32) {
    %c0_i32 = arith.constant 0 : i32
    %c0_i32_0 = arith.constant 0 : i32
    %c0_i32_1 = arith.constant 0 : i32
    %c0_i32_2 = arith.constant 0 : i32
    return %c0_i32, %c0_i32_0, %c0_i32_1 : i32, i32, i32
  }
  func.func @transform_4(%arg0: i32, %arg1: i32) -> (i32, i32, i32, i32) {
    %c0_i32 = arith.constant 0 : i32
    %c0_i32_0 = arith.constant 0 : i32
    %c0_i32_1 = arith.constant 0 : i32
    return %arg0, %arg1, %c0_i32, %c0_i32_0 : i32, i32, i32, i32
  }
}

</mosaic_0001>

<bundles_post_ra>
// kernel: tpu_custom_call.1
= control target key start
LH: loop header
LB: loop body
LE: loop exit
PB: predicated region body
PF: predicated region fallthrough
CT: control target
= control target key end

     0   :  { %s3306_s15 = smov 0   ;;  %s3308_s16 = smov 0   ;;  %s3984_s0 = inlined_call_operand.vmem [shape: bf16[2,224,45,210], index: 0, kind: input, shape index: {}]   ;;  %s3985_s1 = inlined_call_operand.vmem [shape: bf16[15,6,45], index: 1, kind: input, shape index: {}]   ;;  %s3986_s2 = inlined_call_operand.vmem [shape: f32[2,6,1], index: 2, kind: input, shape index: {}]   ;;  %s3987_s3 = inlined_call_operand.vmem [shape: bf16[2,210,105], index: 3, kind: input, shape index: {}]   ;;  %s3988_s4 = inlined_call_operand.vmem [shape: bf16[2,105,6,105], index: 4, kind: output, shape index: {}]  }
   0x1   :  { %s3310_s17 = smov 0   ;;  %s3312_s18 = smov 0  }
   0x2   :  { %s3314_s19 = smov 0  }
   0x3 LB: > { %s23_s20 = sadd.s32 1, %s3265_s17  ;;  %s26_s21 = sadd.s32 1, %s3269_s18  ;;  %s3273_s19 = sphi %s3314_s19, %s14_s19   ;;  %s3269_s18 = sphi %s3312_s18, %s3992_s18   ;;  %s3265_s17 = sphi %s3310_s17, %s3991_s17   ;;  %s3261_s16 = sphi %s3308_s16, %s3990_s16   ;;  %s3257_s15 = sphi %s3306_s15, %s3989_s15  }
   0x4   : > { %p24_p0 = scmp.ge.s32.totalorder %s23_s20, 7  ;;  %p2350_p1 = scmp.ge.s32.totalorder %s3273_s19, 1 }
   0x5   : > { %p176_p2 = scmp.lt.s32.totalorder %s3273_s19, 15 }
   0x6   : > { %s3994_s20 = smov (%p24_p0, %s23_s20), 0  ;;  %s3996_s21 = smov (!%p24_p0, %s26_s21), %s3269_s18 }
   0x7   : > { %p177_p3 = pnand %p2350_p1, %p176_p2  ;;  %p28_p4 = scmp.ge.s32.totalorder %s3996_s21, 2 }
   0x8   : > { %p206_p5 = scmp.lt.s32.totalorder (!%p177_p3), %s3261_s16, 1  ;;  %s211_s22 = smul.u32 (!%p177_p3), 15, %s3257_s15 }
   0x9   : > { %s3998_s21 = smov (%p28_p4, %s3996_s21), 0  ;;  %180 = sbr.rel (%p177_p3) target bundleno = 555 (0x22b), region = 36 }
   0xa   : > { %p214_p6 = scmp.lt.s32.totalorder (!%p177_p3), %s211_s22, 104  ;;  %s254_s23 = smul.u32 (!%p177_p3), 30, %s3257_s15 }
   0xb   : > { %s3435_s6 = smov (!%p177_p3), 0  }
   0xe   : > { %v3342_v0 = vld [vmem:[%s3986_s2] sm:$0x3f]  ;;  %v3347_v1 = vld [vmem:[%s3986_s2 + $0x8] sm:$0x3f]  ;;  %s4000_s16 = smov (!%p206_p5, %s3261_s16), 1  ;;  %s4002_s22 = smov (!%p214_p6, %s211_s22), 104 }
   0xf   : > { %v3352_v2 = vld [vmem:[%s3985_s1] sm:$0x7]  ;;  %v3357_v3 = vld [vmem:[%s3985_s1 + $0x4] sm:$0x7]  ;;  %v3362_v4 = vld [vmem:[%s3985_s1 + $0x8] sm:$0x7] }
  0x10   : > { %v3367_v5 = vld [vmem:[%s3985_s1 + $0xc] sm:$0x7]  ;;  %v3372_v6 = vld [vmem:[%s3985_s1 + $0x10] sm:$0x7]  ;;  %v3377_v7 = vld [vmem:[%s3985_s1 + $0x14] sm:$0x7] }
  0x11   : > { %v3382_v8 = vld [vmem:[%s3985_s1 + $0x18] sm:$0x7]  ;;  %s3178_s24 = smul.u32 10752, %s4000_s16  ;;  %v3388_v9 = vld [vmem:[%s3985_s1 + $0x1c] sm:$0x7] }
  0x12   : > { %v3393_v10 = vld [vmem:[%s3985_s1 + $0x20] sm:$0x7]  ;;  %v3398_v11 = vld [vmem:[%s3985_s1 + $0x24] sm:$0x7]  ;;  %v3403_v12 = vld [vmem:[%s3985_s1 + $0x28] sm:$0x7] }
  0x13   : > { %s3408_s9 = scalar_lea.vmem %s3984_s0, %s3178_s24  ;;  %s3179_s10 = smul.u32 105, %s4000_s16  ;;  %v3413_v13 = vld [vmem:[%s3985_s1 + $0x2c] sm:$0x7]  ;;  %v3418_v14 = vld [vmem:[%s3985_s1 + $0x30] sm:$0x7] }
  0x14   : > { %v3423_v15 = vld [vmem:[%s3985_s1 + $0x34] sm:$0x7]  ;;  %v3428_v16 = vld [vmem:[%s3985_s1 + $0x38] sm:$0x7] }
  0x15   : > { %s217_s16 = sadd.s32 %s3179_s10, %s4002_s22 }
  0x16   : > { %s2352_s24 = sshll.u32 %s217_s16, 2 }
  0x17   : > { %s3433_s5 = scalar_lea.vmem %s3988_s4, %s2352_s24 }
  0x18 LB: >> { %vm314_vm0 = vcmask 1045504   ;;  %s2368_s7 = sshll.u32 %s3277_s6, 1  ;;  %vm315_vm1 = vcmask 1046528   ;;  %v3279_v17 = vmov 65535   ;;  %vm310_vm2 = vcmask 367616   ;;  %s3052_s16 = sshll.u32 %s3277_s6, 2  ;;  %s3277_s6 = sphi %s3435_s6, %s260_s6  }
  0x19   : >> { %s262_s22 = sadd.s32 %s2368_s7, %s254_s23  ;;  %v316_v18 = vsel %vm314_vm0, 4294967295, %v3279_v17  ;;  %vm1986_vm3 = vcmask 1040384   ;;  %vm1982_vm4 = vcmask 670720   ;;  %s2157_s24 = scalar_lea.vmem %s3433_s5, %s3052_s16  ;;  %vm2158_vm5 = vcmask 854016  }
  0x1a   : >> { %s3055_s8 = smul.u32 48, %s262_s22  ;;  %v3446_v19 = vsel %vm315_vm1, %v316_v18, 0  ;;  %s260_s6 = sadd.s32 1, %s3277_s6  }
  0x1b   : >> { %p257_p7 = scmp.ge.s32.totalorder %s260_s6, 15  }
  0x1c   : >> { %s3444_s10 = scalar_lea.vmem %s3408_s9, %s3055_s8 }
  0x1d   : >> { %v2395_v20 = vld [vmem:[%s3444_s10 + $0x50] sm:$0xf]  ;;  %v3067_v21 = vld [vmem:[%s3444_s10 + $0x54] sm:$0x70]  ;;  %v3066_v22 = vld [vmem:[%s3444_s10 + $0x54] sm:$0xf] }
  0x1e   : >> { %v2396_v23 = vor.u32 %v3067_v21, %v2395_v20  ;;  %v2397_v24 = vld [vmem:[%s3444_s10 + $0x58] sm:$0x70]  ;;  %v2421_v25 = vld [vmem:[%s3444_s10 + $0x20] sm:$0xf]  ;;  %v3061_v26 = vld [vmem:[%s3444_s10 + $0x24] sm:$0x70] }
  0x1f   : >> { %v2400_v27 = vor.u32 %v3066_v22, %v2397_v24  ;;  %v2422_v28 = vor.u32 %v3061_v26, %v2421_v25  ;;  %v3060_v29 = vld [vmem:[%s3444_s10 + $0x24] sm:$0xf]  ;;  %v2423_v30 = vld [vmem:[%s3444_s10 + $0x28] sm:$0x70]  ;;  %v2387_v31 = vld [vmem:[%s3444_s10 + $0x40] sm:$0xf] }
  0x20   : >> { %v319_v32 = vand.u32 %v2396_v23, %v3446_v19  ;;  %v2426_v33 = vor.u32 %v3060_v29, %v2423_v30  ;;  %v3065_v34 = vld [vmem:[%s3444_s10 + $0x44] sm:$0xf0]  ;;  %v3064_v35 = vld [vmem:[%s3444_s10 + $0x44] sm:$0xf]  ;;  %v2389_v36 = vld [vmem:[%s3444_s10 + $0x48] sm:$0xf0] }
  0x21   : >> { %v322_v37 = vand.u32 %v2400_v27, %v3446_v19  ;;  %v382_v38 = vand.u32 %v2422_v28, %v3446_v19  ;;  %v2413_v39 = vld [vmem:[%s3444_s10 + $0x10] sm:$0xf]  ;;  %v3059_v40 = vld [vmem:[%s3444_s10 + $0x14] sm:$0xf0]  ;;  %v3058_v41 = vld [vmem:[%s3444_s10 + $0x14] sm:$0xf]  ;;  %v2388_v43 = vor.u32 %v3065_v34, %v2387_v31  ;;  %v2392_v47 = vor.u32 %v3064_v35, %v2389_v36 }
  0x22   : >> { %329 = vmatpush.bf16.msra.mxu0 %v319_v32  ;;  %v385_v42 = vand.u32 %v2426_v33, %v3446_v19  ;;  %v2415_v44 = vld [vmem:[%s3444_s10 + $0x18] sm:$0xf0]  ;;  %v2379_v45 = vld [vmem:[%s3444_s10 + $0x30] sm:$0xf]  ;;  %v3063_v46 = vld [vmem:[%s3444_s10 + $0x34] sm:$0xf0]  ;;  %v2414_v48 = vor.u32 %v3059_v40, %v2413_v39 }
  0x23   : >> { %342 = vmatpush.bf16.msra.mxu1 %v322_v37  ;;  %392 = vmatpush.bf16.msra.mxu2 %v382_v38  ;;  %v3062_v49 = vld [vmem:[%s3444_s10 + $0x34] sm:$0xf]  ;;  %v2381_v50 = vld [vmem:[%s3444_s10 + $0x38] sm:$0xf0]  ;;  %v2405_v51 = vld [vmem:[%s3444_s10] sm:$0xf]  ;;  %v2418_v52 = vor.u32 %v3058_v41, %v2415_v44  ;;  %v2380_v59 = vor.u32 %v3063_v46, %v2379_v45 }
  0x24   : >> { %405 = vmatpush.bf16.msra.mxu3 %v385_v42  ;;  %v3057_v53 = vld [vmem:[%s3444_s10 + $0x4] sm:$0xf0]  ;;  %v3056_v54 = vld [vmem:[%s3444_s10 + $0x4] sm:$0xf]  ;;  %v2407_v55 = vld [vmem:[%s3444_s10 + $0x8] sm:$0xf0]  ;;  %v2384_v61 = vor.u32 %v3062_v49, %v2381_v50 }
  0x25   : >> { %v2454_v56 = vld [vmem:[%s3444_s10 + $0x80] sm:$0xf]  ;;  %v3073_v57 = vld [vmem:[%s3444_s10 + $0x84] sm:$0x70]  ;;  %v3072_v58 = vld [vmem:[%s3444_s10 + $0x84] sm:$0xf]  ;;  %v2406_v62 = vor.u32 %v3057_v53, %v2405_v51  ;;  %v2410_v17 = vor.u32 %v3056_v54, %v2407_v55 }
  0x26   : >> { %330 = vmatpush.bf16.msra.mxu0 %v2388_v43  ;;  %v2456_v60 = vld [vmem:[%s3444_s10 + $0x88] sm:$0x70]  ;;  %v2455_v63 = vor.u32 %v3073_v57, %v2454_v56  ;;  %v2491_v20 = vld [vmem:[%s3444_s10 + $0xb0] sm:$0xf]  ;;  %v3079_v21 = vld [vmem:[%s3444_s10 + $0xb4] sm:$0x70] }
  0x27   : >> { %343 = vmatpush.bf16.msra.mxu1 %v2392_v47  ;;  %393 = vmatpush.bf16.msra.mxu2 %v2414_v48  ;;  %v2459_v18 = vor.u32 %v3072_v58, %v2456_v60  ;;  %v3078_v23 = vld [vmem:[%s3444_s10 + $0xb4] sm:$0xf]  ;;  %v2493_v24 = vld [vmem:[%s3444_s10 + $0xb8] sm:$0x70]  ;;  %v2446_v26 = vld [vmem:[%s3444_s10 + $0x70] sm:$0xf]  ;;  %v2492_v30 = vor.u32 %v3079_v21, %v2491_v20 }
  0x28   : >> { %406 = vmatpush.bf16.msra.mxu3 %v2418_v52  ;;  %v452_v22 = vand.u32 %v2455_v63, %v3446_v19  ;;  %v3071_v27 = vld [vmem:[%s3444_s10 + $0x74] sm:$0xf0]  ;;  %v3070_v28 = vld [vmem:[%s3444_s10 + $0x74] sm:$0xf]  ;;  %v2448_v29 = vld [vmem:[%s3444_s10 + $0x78] sm:$0xf0]  ;;  %v2496_v31 = vor.u32 %v3078_v23, %v2493_v24 }
  0x29   : >> { %v455_v25 = vand.u32 %v2459_v18, %v3446_v19  ;;  %v2451_v33 = vor.u32 %v3070_v28, %v2448_v29  ;;  %v2438_v34 = vld [vmem:[%s3444_s10 + $0x60] sm:$0xf]  ;;  %v3069_v35 = vld [vmem:[%s3444_s10 + $0x64] sm:$0xf0]  ;;  %v3068_v36 = vld [vmem:[%s3444_s10 + $0x64] sm:$0xf]  ;;  %v579_v38 = vand.u32 %v2492_v30, %v3446_v19 }
  0x2a   : >> { %331 = vmatpush.bf16.msra.mxu0 %v2380_v59  ;;  %v582_v39 = vand.u32 %v2496_v31, %v3446_v19  ;;  %v2483_v40 = vld [vmem:[%s3444_s10 + $0xa0] sm:$0xf]  ;;  %v3077_v41 = vld [vmem:[%s3444_s10 + $0xa4] sm:$0xf0]  ;;  %v2439_v42 = vor.u32 %v3069_v35, %v2438_v34  ;;  %v3076_v44 = vld [vmem:[%s3444_s10 + $0xa4] sm:$0xf] }
  0x2b   : >> { %344 = vmatpush.bf16.msra.mxu1 %v2384_v61  ;;  %394 = vmatpush.bf16.msra.mxu2 %v2406_v62  ;;  %v2484_v46 = vor.u32 %v3077_v41, %v2483_v40  ;;  %v2526_v48 = vld [vmem:[%s3444_s10 + $0xe0] sm:$0xf]  ;;  %v3085_v49 = vld [vmem:[%s3444_s10 + $0xe4] sm:$0x70]  ;;  %v3084_v50 = vld [vmem:[%s3444_s10 + $0xe4] sm:$0xf] }
  0x2c   : >> { %407 = vmatpush.bf16.msra.mxu3 %v2410_v17  ;;  %v2528_v51 = vld [vmem:[%s3444_s10 + $0xe8] sm:$0x70]  ;;  %v2475_v52 = vld [vmem:[%s3444_s10 + $0x90] sm:$0xf]  ;;  %v3075_v53 = vld [vmem:[%s3444_s10 + $0x94] sm:$0xf0]  ;;  %v2527_v56 = vor.u32 %v3085_v49, %v2526_v48 }
  0x2d   : >> { %2401 = vmatmul.msk.bf16.vlgmr.msra.gmra.mxu0 %vm310_vm2, %v3357_v3  ;;  %v3074_v54 = vld [vmem:[%s3444_s10 + $0x94] sm:$0xf]  ;;  %v2477_v55 = vld [vmem:[%s3444_s10 + $0x98] sm:$0xf0]  ;;  %v2531_v57 = vor.u32 %v3084_v50, %v2528_v51  ;;  %v2476_v58 = vor.u32 %v3075_v53, %v2475_v52  ;;  %v2518_v62 = vld [vmem:[%s3444_s10 + $0xd0] sm:$0xf] }
  0x2e   : >> { %2402 = vmatmul.msk.bf16.vlgmr.msra.gmra.mxu1 %vm310_vm2, %v3357_v3  ;;  %2427 = vmatmul.msk.bf16.vlgmr.msra.gmra.mxu2 %vm310_vm2, %v3352_v2  ;;  %v682_v60 = vand.u32 %v2527_v56, %v3446_v19  ;;  %v3083_v63 = vld [vmem:[%s3444_s10 + $0xd4] sm:$0xf0]  ;;  %v3082_v17 = vld [vmem:[%s3444_s10 + $0xd4] sm:$0xf]  ;;  %v2520_v18 = vld [vmem:[%s3444_s10 + $0xd8] sm:$0xf0] }
  0x2f   : >> { %488 = vmatpush.bf16.msrb.mxu2 %v319_v32  ;;  %2428 = vmatmul.msk.bf16.vlgmr.msra.gmra.mxu3 %vm310_vm2, %v3352_v2  ;;  %v2447_v32 = vor.u32 %v3071_v27, %v2446_v26  ;;  %v2519_v20 = vor.u32 %v3083_v63, %v2518_v62  ;;  %v2523_v21 = vor.u32 %v3082_v17, %v2520_v18  ;;  %v3081_v23 = vld [vmem:[%s3444_s10 + $0xc4] sm:$0xf0]  ;;  %v3080_v24 = vld [vmem:[%s3444_s10 + $0xc4] sm:$0xf]  ;;  %v2561_v26 = vld [vmem:[%s3444_s10 + $0x110] sm:$0xf] }
  0x30   : >> { %501 = vmatpush.bf16.msrb.mxu3 %v322_v37  ;;  %462 = vmatpush.bf16.msrb.mxu0 %v452_v22  ;;  %v2440_v37 = vld [vmem:[%s3444_s10 + $0x68] sm:$0xf0]  ;;  %v3091_v27 = vld [vmem:[%s3444_s10 + $0x114] sm:$0x70]  ;;  %v3090_v29 = vld [vmem:[%s3444_s10 + $0x114] sm:$0xf] }
  0x31   : >> { %475 = vmatpush.bf16.msrb.mxu1 %v455_v25  ;;  %v2443_v45 = vor.u32 %v3068_v36, %v2440_v37  ;;  %v2563_v30 = vld [vmem:[%s3444_s10 + $0x118] sm:$0x70]  ;;  %v2553_v36 = vld [vmem:[%s3444_s10 + $0x100] sm:$0xf]  ;;  %v3089_v37 = vld [vmem:[%s3444_s10 + $0x104] sm:$0xf0] }
  0x32   : >> { %v2554_v40 = vor.u32 %v3089_v37, %v2553_v36  ;;  %v2596_v48 = vld [vmem:[%s3444_s10 + $0x140] sm:$0xf]  ;;  %v3097_v49 = vld [vmem:[%s3444_s10 + $0x144] sm:$0x70]  ;;  %v3096_v50 = vld [vmem:[%s3444_s10 + $0x144] sm:$0xf] }
  0x33   : >> { %489 = vmatpush.bf16.msrb.mxu2 %v2388_v43  ;;  %v2485_v43 = vld [vmem:[%s3444_s10 + $0xa8] sm:$0xf0]  ;;  %v2597_v52 = vor.u32 %v3097_v49, %v2596_v48  ;;  %v2588_v56 = vld [vmem:[%s3444_s10 + $0x130] sm:$0xf]  ;;  %v2580_v62 = vld [vmem:[%s3444_s10 + $0x120] sm:$0xf] }
  0x34   : >> { %502 = vmatpush.bf16.msrb.mxu3 %v2392_v47  ;;  %463 = vmatpush.bf16.msrb.mxu0 %v2447_v32  ;;  %v2488_v47 = vor.u32 %v3076_v44, %v2485_v43  ;;  %v3087_v44 = vld [vmem:[%s3444_s10 + $0xf4] sm:$0xf0]  ;;  %v3086_v43 = vld [vmem:[%s3444_s10 + $0xf4] sm:$0xf]  ;;  %v2598_v51 = vld [vmem:[%s3444_s10 + $0x148] sm:$0x70] }
  0x35   : >> { %476 = vmatpush.bf16.msrb.mxu1 %v2451_v33  ;;  %v2601_v53 = vor.u32 %v3096_v50, %v2598_v51  ;;  %v3093_v63 = vld [vmem:[%s3444_s10 + $0x124] sm:$0xf0]  ;;  %v3092_v17 = vld [vmem:[%s3444_s10 + $0x124] sm:$0xf]  ;;  %v2582_v18 = vld [vmem:[%s3444_s10 + $0x128] sm:$0xf0] }
  0x36   : >> { %v2615_v36 = vld [vmem:[%s3444_s10 + $0x150] sm:$0xf]  ;;  %v3099_v37 = vld [vmem:[%s3444_s10 + $0x154] sm:$0xf0] }
  0x37   : >> { %490 = vmatpush.bf16.msrb.mxu2 %v2380_v59  ;;  %v2480_v59 = vor.u32 %v3074_v54, %v2477_v55  ;;  %v888_v54 = vand.u32 %v2597_v52, %v3446_v19  ;;  %v891_v55 = vand.u32 %v2601_v53, %v3446_v19  ;;  %v2658_v50 = vld [vmem:[%s3444_s10 + $0x190] sm:$0xf]  ;;  %v3107_v51 = vld [vmem:[%s3444_s10 + $0x194] sm:$0xf0]  ;;  %v3106_v52 = vld [vmem:[%s3444_s10 + $0x194] sm:$0xf] }
  0x38   : >> { %503 = vmatpush.bf16.msrb.mxu3 %v2384_v61  ;;  %464 = vmatpush.bf16.msrb.mxu0 %v2439_v42  ;;  %v685_v61 = vand.u32 %v2531_v57, %v3446_v19  ;;  %v3095_v57 = vld [vmem:[%s3444_s10 + $0x134] sm:$0xf0]  ;;  %v2660_v53 = vld [vmem:[%s3444_s10 + $0x198] sm:$0xf0] }
  0x39   : >> { %477 = vmatpush.bf16.msrb.mxu1 %v2443_v45 }
  0x3b   : >> { %589 = vmatpush.bf16.msra.mxu2 %v579_v38 }
  0x3c   : >> { %602 = vmatpush.bf16.msra.mxu3 %v582_v39  ;;  %517 = vmatpush.bf16.msra.mxu0 %v452_v22  ;;  %v2510_v22 = vld [vmem:[%s3444_s10 + $0xc0] sm:$0xf] }
  0x3d   : >> { %530 = vmatpush.bf16.msra.mxu1 %v455_v25  ;;  %2460 = vmatmul.msk.bf16.vlgmr.msrb.gmra.mxu0 %vm310_vm2, %v3357_v3  ;;  %v2512_v25 = vld [vmem:[%s3444_s10 + $0xc8] sm:$0xf0]  ;;  %v2511_v28 = vor.u32 %v3081_v23, %v2510_v22  ;;  %v2631_v22 = vld [vmem:[%s3444_s10 + $0x170] sm:$0xf]  ;;  %v3103_v23 = vld [vmem:[%s3444_s10 + $0x174] sm:$0x70] }
  0x3e   : >> { %2461 = vmatmul.msk.bf16.vlgmr.msrb.gmra.mxu1 %vm310_vm2, %v3357_v3  ;;  %2462 = vmatmul.msk.bf16.vlgmr.msrb.gmra.mxu2 %vm310_vm2, %v3352_v2  ;;  %v2515_v31 = vor.u32 %v3080_v24, %v2512_v25  ;;  %v3102_v24 = vld [vmem:[%s3444_s10 + $0x174] sm:$0xf]  ;;  %v2633_v25 = vld [vmem:[%s3444_s10 + $0x178] sm:$0x70] }
  0x3f   : >> { %590 = vmatpush.bf16.msra.mxu2 %v2484_v46  ;;  %2463 = vmatmul.msk.bf16.vlgmr.msrb.gmra.mxu3 %vm310_vm2, %v3352_v2 }
  0x40   : >> { %603 = vmatpush.bf16.msra.mxu3 %v2488_v47  ;;  %518 = vmatpush.bf16.msra.mxu0 %v2447_v32  ;;  %v2562_v32 = vor.u32 %v3091_v27, %v2561_v26  ;;  %v2632_v26 = vor.u32 %v3103_v23, %v2631_v22  ;;  %v2636_v27 = vor.u32 %v3102_v24, %v2633_v25  ;;  %v2693_v24 = vld [vmem:[%s3444_s10 + $0x1c0] sm:$0xf]  ;;  %v3113_v25 = vld [vmem:[%s3444_s10 + $0x1c4] sm:$0xf0] }
  0x41   : >> { %531 = vmatpush.bf16.msra.mxu1 %v2451_v33  ;;  %v2566_v33 = vor.u32 %v3090_v29, %v2563_v30  ;;  %v2623_v30 = vld [vmem:[%s3444_s10 + $0x160] sm:$0xf] }
  0x42   : >> { %v785_v34 = vand.u32 %v2562_v32, %v3446_v19  ;;  %v994_v29 = vand.u32 %v2636_v27, %v3446_v19  ;;  %v3100_v32 = vld [vmem:[%s3444_s10 + $0x164] sm:$0xf]  ;;  %v2695_v27 = vld [vmem:[%s3444_s10 + $0x1c8] sm:$0xf0] }
  0x43   : >> { %591 = vmatpush.bf16.msra.mxu2 %v2476_v58  ;;  %v788_v35 = vand.u32 %v2566_v33, %v3446_v19  ;;  %v2625_v33 = vld [vmem:[%s3444_s10 + $0x168] sm:$0xf0] }
  0x44   : >> { %604 = vmatpush.bf16.msra.mxu3 %v2480_v59  ;;  %519 = vmatpush.bf16.msra.mxu0 %v2439_v42  ;;  %v2545_v42 = vld [vmem:[%s3444_s10 + $0xf0] sm:$0xf] }
  0x45   : >> { %532 = vmatpush.bf16.msra.mxu1 %v2443_v45  ;;  %v2547_v45 = vld [vmem:[%s3444_s10 + $0xf8] sm:$0xf0] }
  0x47   : >> { %692 = vmatpush.bf16.msrb.mxu2 %v682_v60 }
  0x48   : >> { %705 = vmatpush.bf16.msrb.mxu3 %v685_v61  ;;  %620 = vmatpush.bf16.msrb.mxu0 %v579_v38  ;;  %v3088_v38 = vld [vmem:[%s3444_s10 + $0x104] sm:$0xf] }
  0x49   : >> { %633 = vmatpush.bf16.msrb.mxu1 %v582_v39  ;;  %v2555_v39 = vld [vmem:[%s3444_s10 + $0x108] sm:$0xf0] }
  0x4a   : >> { %v2558_v41 = vor.u32 %v3088_v38, %v2555_v39  ;;  %v3098_v38 = vld [vmem:[%s3444_s10 + $0x154] sm:$0xf]  ;;  %v2617_v39 = vld [vmem:[%s3444_s10 + $0x158] sm:$0xf0] }
  0x4b   : >> { %693 = vmatpush.bf16.msrb.mxu2 %v2519_v20 }
  0x4c   : >> { %706 = vmatpush.bf16.msrb.mxu3 %v2523_v21  ;;  %621 = vmatpush.bf16.msrb.mxu0 %v2484_v46  ;;  %v2546_v46 = vor.u32 %v3087_v44, %v2545_v42  ;;  %v2666_v42 = vld [vmem:[%s3444_s10 + $0x1a0] sm:$0xf]  ;;  %v3109_v44 = vld [vmem:[%s3444_s10 + $0x1a4] sm:$0x70] }
  0x4d   : >> { %634 = vmatpush.bf16.msrb.mxu1 %v2488_v47  ;;  %2464 = vmatmul.msk.bf16.vlgmr.msra.gmra.mxu0 %vm310_vm2, %v3362_v4  ;;  %v2550_v47 = vor.u32 %v3086_v43, %v2547_v45  ;;  %v3108_v43 = vld [vmem:[%s3444_s10 + $0x1a4] sm:$0xf]  ;;  %v2668_v45 = vld [vmem:[%s3444_s10 + $0x1a8] sm:$0x70] }
  0x4e   : >> { %2465 = vmatmul.msk.bf16.vlgmr.msra.gmra.mxu1 %vm310_vm2, %v3362_v4  ;;  %2497 = vmatmul.msk.bf16.vlgmr.msra.gmra.mxu2 %vm310_vm2, %v3362_v4 }
  0x4f   : >> { %694 = vmatpush.bf16.msrb.mxu2 %v2511_v28  ;;  %2498 = vmatmul.msk.bf16.vlgmr.msra.gmra.mxu3 %vm310_vm2, %v3362_v4 }
  0x50   : >> { %707 = vmatpush.bf16.msrb.mxu3 %v2515_v31  ;;  %622 = vmatpush.bf16.msrb.mxu0 %v2476_v58  ;;  %v3094_v58 = vld [vmem:[%s3444_s10 + $0x134] sm:$0xf] }
  0x51   : >> { %635 = vmatpush.bf16.msrb.mxu1 %v2480_v59  ;;  %v2590_v59 = vld [vmem:[%s3444_s10 + $0x138] sm:$0xf0] }
  0x53   : >> { %795 = vmatpush.bf16.msra.mxu2 %v785_v34 }
  0x54   : >> { %808 = vmatpush.bf16.msra.mxu3 %v788_v35  ;;  %723 = vmatpush.bf16.msra.mxu0 %v682_v60  ;;  %v2589_v60 = vor.u32 %v3095_v57, %v2588_v56  ;;  %v2650_v56 = vld [vmem:[%s3444_s10 + $0x180] sm:$0xf]  ;;  %v3105_v57 = vld [vmem:[%s3444_s10 + $0x184] sm:$0xf0] }
  0x55   : >> { %736 = vmatpush.bf16.msra.mxu1 %v685_v61  ;;  %v2593_v61 = vor.u32 %v3094_v58, %v2590_v59  ;;  %v3104_v58 = vld [vmem:[%s3444_s10 + $0x184] sm:$0xf]  ;;  %v2652_v59 = vld [vmem:[%s3444_s10 + $0x188] sm:$0xf0] }
  0x57   : >> { %796 = vmatpush.bf16.msra.mxu2 %v2554_v40 }
  0x58   : >> { %809 = vmatpush.bf16.msra.mxu3 %v2558_v41  ;;  %724 = vmatpush.bf16.msra.mxu0 %v2519_v20  ;;  %v2581_v20 = vor.u32 %v3093_v63, %v2580_v62  ;;  %v2701_v62 = vld [vmem:[%s3444_s10 + $0x1d0] sm:$0xf]  ;;  %v3115_v63 = vld [vmem:[%s3444_s10 + $0x1d4] sm:$0x70] }
  0x59   : >> { %737 = vmatpush.bf16.msra.mxu1 %v2523_v21  ;;  %v2585_v21 = vor.u32 %v3092_v17, %v2582_v18  ;;  %v3114_v17 = vld [vmem:[%s3444_s10 + $0x1d4] sm:$0xf]  ;;  %v2703_v18 = vld [vmem:[%s3444_s10 + $0x1d8] sm:$0x70] }
  0x5b   : >> { %797 = vmatpush.bf16.msra.mxu2 %v2546_v46 }
  0x5c   : >> { %810 = vmatpush.bf16.msra.mxu3 %v2550_v47  ;;  %725 = vmatpush.bf16.msra.mxu0 %v2511_v28  ;;  %v991_v28 = vand.u32 %v2632_v26, %v3446_v19  ;;  %v3112_v26 = vld [vmem:[%s3444_s10 + $0x1c4] sm:$0xf] }
  0x5d   : >> { %738 = vmatpush.bf16.msra.mxu1 %v2515_v31  ;;  %2499 = vmatmul.msk.bf16.vlgmr.msrb.gmra.mxu0 %vm310_vm2, %v3367_v5  ;;  %v3101_v31 = vld [vmem:[%s3444_s10 + $0x164] sm:$0xf0] }
  0x5e   : >> { %2500 = vmatmul.msk.bf16.vlgmr.msrb.gmra.mxu1 %vm310_vm2, %v3367_v5  ;;  %2532 = vmatmul.msk.bf16.vlgmr.msrb.gmra.mxu2 %vm310_vm2, %v3367_v5 }
  0x5f   : >> { %2533 = vmatmul.msk.bf16.vlgmr.msrb.gmra.mxu3 %vm310_vm2, %v3367_v5  ;;  %898 = vmatpush.bf16.msrb.mxu2 %v888_v54 }
  0x60   : >> { %911 = vmatpush.bf16.msrb.mxu3 %v891_v55  ;;  %826 = vmatpush.bf16.msrb.mxu0 %v785_v34  ;;  %v2624_v34 = vor.u32 %v3101_v31, %v2623_v30  ;;  %v2685_v30 = vld [vmem:[%s3444_s10 + $0x1b0] sm:$0xf]  ;;  %v3111_v31 = vld [vmem:[%s3444_s10 + $0x1b4] sm:$0xf0] }
  0x61   : >> { %839 = vmatpush.bf16.msrb.mxu1 %v788_v35  ;;  %v2628_v35 = vor.u32 %v3100_v32, %v2625_v33  ;;  %v3110_v32 = vld [vmem:[%s3444_s10 + $0x1b4] sm:$0xf]  ;;  %v2687_v33 = vld [vmem:[%s3444_s10 + $0x1b8] sm:$0xf0] }
  0x63   : >> { %899 = vmatpush.bf16.msrb.mxu2 %v2589_v60 }
  0x64   : >> { %912 = vmatpush.bf16.msrb.mxu3 %v2593_v61  ;;  %827 = vmatpush.bf16.msrb.mxu0 %v2554_v40  ;;  %v2616_v40 = vor.u32 %v3099_v37, %v2615_v36  ;;  %v2736_v36 = vld [vmem:[%s3444_s10 + $0x200] sm:$0xf]  ;;  %v3121_v37 = vld [vmem:[%s3444_s10 + $0x204] sm:$0x70] }
  0x65   : >> { %840 = vmatpush.bf16.msrb.mxu1 %v2558_v41  ;;  %v2620_v41 = vor.u32 %v3098_v38, %v2617_v39  ;;  %v3120_v38 = vld [vmem:[%s3444_s10 + $0x204] sm:$0xf]  ;;  %v2738_v39 = vld [vmem:[%s3444_s10 + $0x208] sm:$0x70] }
  0x67   : >> { %900 = vmatpush.bf16.msrb.mxu2 %v2581_v20 }
  0x68   : >> { %913 = vmatpush.bf16.msrb.mxu3 %v2585_v21  ;;  %828 = vmatpush.bf16.msrb.mxu0 %v2546_v46  ;;  %v2667_v46 = vor.u32 %v3109_v44, %v2666_v42 }
  0x69   : >> { %841 = vmatpush.bf16.msrb.mxu1 %v2550_v47  ;;  %v2671_v47 = vor.u32 %v3108_v43, %v2668_v45  ;;  %v2728_v43 = vld [vmem:[%s3444_s10 + $0x1f0] sm:$0xf]  ;;  %v3119_v45 = vld [vmem:[%s3444_s10 + $0x1f4] sm:$0xf0] }
  0x6a   : >> { %v1094_v48 = vand.u32 %v2667_v46, %v3446_v19  ;;  %v3118_v46 = vld [vmem:[%s3444_s10 + $0x1f4] sm:$0xf] }
  0x6b   : >> { %v1097_v49 = vand.u32 %v2671_v47, %v3446_v19  ;;  %v2730_v47 = vld [vmem:[%s3444_s10 + $0x1f8] sm:$0xf0] }
  0x6d   : >> { %2534 = vmatmul.msk.bf16.vlgmr.msra.gmra.mxu0 %vm310_vm2, %v3372_v6 }
  0x6e   : >> { %2535 = vmatmul.msk.bf16.vlgmr.msra.gmra.mxu1 %vm310_vm2, %v3372_v6  ;;  %2567 = vmatmul.msk.bf16.vlgmr.msra.gmra.mxu2 %vm310_vm2, %v3372_v6 }
  0x6f   : >> { %2568 = vmatmul.msk.bf16.vlgmr.msra.gmra.mxu3 %vm310_vm2, %v3372_v6  ;;  %1001 = vmatpush.bf16.msra.mxu2 %v991_v28 }
  0x70   : >> { %1014 = vmatpush.bf16.msra.mxu3 %v994_v29  ;;  %929 = vmatpush.bf16.msra.mxu0 %v888_v54  ;;  %v2659_v54 = vor.u32 %v3107_v51, %v2658_v50  ;;  %v2720_v50 = vld [vmem:[%s3444_s10 + $0x1e0] sm:$0xf]  ;;  %v3117_v51 = vld [vmem:[%s3444_s10 + $0x1e4] sm:$0xf0] }
  0x71   : >> { %942 = vmatpush.bf16.msra.mxu1 %v891_v55  ;;  %v2663_v55 = vor.u32 %v3106_v52, %v2660_v53  ;;  %v3116_v52 = vld [vmem:[%s3444_s10 + $0x1e4] sm:$0xf]  ;;  %v2722_v53 = vld [vmem:[%s3444_s10 + $0x1e8] sm:$0xf0] }
  0x73   : >> { %1002 = vmatpush.bf16.msra.mxu2 %v2624_v34 }
  0x74   : >> { %1015 = vmatpush.bf16.msra.mxu3 %v2628_v35  ;;  %930 = vmatpush.bf16.msra.mxu0 %v2589_v60  ;;  %v2651_v60 = vor.u32 %v3105_v57, %v2650_v56  ;;  %v2771_v56 = vld [vmem:[%s3444_s10 + $0x230] sm:$0xf]  ;;  %v3127_v57 = vld [vmem:[%s3444_s10 + $0x234] sm:$0x70] }
  0x75   : >> { %943 = vmatpush.bf16.msra.mxu1 %v2593_v61  ;;  %v2655_v61 = vor.u32 %v3104_v58, %v2652_v59  ;;  %v3126_v58 = vld [vmem:[%s3444_s10 + $0x234] sm:$0xf]  ;;  %v2773_v59 = vld [vmem:[%s3444_s10 + $0x238] sm:$0x70] }
  0x77   : >> { %1003 = vmatpush.bf16.msra.mxu2 %v2616_v40 }
  0x78   : >> { %1016 = vmatpush.bf16.msra.mxu3 %v2620_v41  ;;  %931 = vmatpush.bf16.msra.mxu0 %v2581_v20  ;;  %v2702_v20 = vor.u32 %v3115_v63, %v2701_v62 }
  0x79   : >> { %944 = vmatpush.bf16.msra.mxu1 %v2585_v21  ;;  %v2706_v21 = vor.u32 %v3114_v17, %v2703_v18 }
  0x7a   : >> { %v1197_v22 = vand.u32 %v2702_v20, %v3446_v19  ;;  %v2763_v20 = vld [vmem:[%s3444_s10 + $0x220] sm:$0xf] }
  0x7b   : >> { %v1200_v23 = vand.u32 %v2706_v21, %v3446_v19  ;;  %v3125_v21 = vld [vmem:[%s3444_s10 + $0x224] sm:$0xf0] }
  0x7d   : >> { %2569 = vmatmul.msk.bf16.vlgmr.msrb.gmra.mxu0 %vm310_vm2, %v3377_v7 }
  0x7e   : >> { %2570 = vmatmul.msk.bf16.vlgmr.msrb.gmra.mxu1 %vm310_vm2, %v3377_v7  ;;  %2602 = vmatmul.msk.bf16.vlgmr.msrb.gmra.mxu2 %vm310_vm2, %v3377_v7 }
  0x7f   : >> { %2603 = vmatmul.msk.bf16.vlgmr.msrb.gmra.mxu3 %vm310_vm2, %v3377_v7  ;;  %1104 = vmatpush.bf16.msrb.mxu2 %v1094_v48 }
  0x80   : >> { %1117 = vmatpush.bf16.msrb.mxu3 %v1097_v49  ;;  %1032 = vmatpush.bf16.msrb.mxu0 %v991_v28  ;;  %v2694_v28 = vor.u32 %v3113_v25, %v2693_v24  ;;  %v3684_v24 = vor.u32 %v3125_v21, %v2763_v20 }
  0x81   : >> { %1045 = vmatpush.bf16.msrb.mxu1 %v994_v29  ;;  %v2698_v29 = vor.u32 %v3112_v26, %v2695_v27  ;;  %v2755_v26 = vld [vmem:[%s3444_s10 + $0x210] sm:$0xf]  ;;  %v3123_v27 = vld [vmem:[%s3444_s10 + $0x214] sm:$0xf0] }
  0x83   : >> { %1105 = vmatpush.bf16.msrb.mxu2 %v2659_v54 }
  0x84   : >> { %1118 = vmatpush.bf16.msrb.mxu3 %v2663_v55  ;;  %1033 = vmatpush.bf16.msrb.mxu0 %v2624_v34  ;;  %v2686_v34 = vor.u32 %v3111_v31, %v2685_v30  ;;  %v2757_v30 = vld [vmem:[%s3444_s10 + $0x218] sm:$0xf0] }
  0x85   : >> { %1046 = vmatpush.bf16.msrb.mxu1 %v2628_v35  ;;  %v2690_v35 = vor.u32 %v3110_v32, %v2687_v33 }
  0x87   : >> { %1106 = vmatpush.bf16.msrb.mxu2 %v2651_v60 }
  0x88   : >> { %1119 = vmatpush.bf16.msrb.mxu3 %v2655_v61  ;;  %1034 = vmatpush.bf16.msrb.mxu0 %v2616_v40  ;;  %v2737_v40 = vor.u32 %v3121_v37, %v2736_v36  ;;  %v2756_v36 = vor.u32 %v3123_v27, %v2755_v26  ;;  %v3139_v26 = vld [vmem:[%s3444_s10 + $0x294] sm:$0x70]  ;;  %v2843_v27 = vld [vmem:[%s3444_s10 + $0x298] sm:$0x70] }
  0x89   : >> { %1047 = vmatpush.bf16.msrb.mxu1 %v2620_v41  ;;  %v2741_v41 = vor.u32 %v3120_v38, %v2738_v39  ;;  %v2806_v38 = vld [vmem:[%s3444_s10 + $0x260] sm:$0xf]  ;;  %v3133_v39 = vld [vmem:[%s3444_s10 + $0x264] sm:$0x70] }
  0x8a   : >> { %v1300_v42 = vand.u32 %v2737_v40, %v3446_v19  ;;  %v3132_v40 = vld [vmem:[%s3444_s10 + $0x264] sm:$0xf] }
  0x8b   : >> { %v1303_v44 = vand.u32 %v2741_v41, %v3446_v19  ;;  %v2808_v41 = vld [vmem:[%s3444_s10 + $0x268] sm:$0x70] }
  0x8d   : >> { %2604 = vmatmul.msk.bf16.vlgmr.msra.gmra.mxu0 %vm310_vm2, %v3382_v8 }
  0x8e   : >> { %2605 = vmatmul.msk.bf16.vlgmr.msra.gmra.mxu1 %vm310_vm2, %v3382_v8  ;;  %2637 = vmatmul.msk.bf16.vlgmr.msra.gmra.mxu2 %vm310_vm2, %v3382_v8 }
  0x8f   : >> { %2638 = vmatmul.msk.bf16.vlgmr.msra.gmra.mxu3 %vm310_vm2, %v3382_v8  ;;  %1207 = vmatpush.bf16.msra.mxu2 %v1197_v22 }
  0x90   : >> { %1220 = vmatpush.bf16.msra.mxu3 %v1200_v23  ;;  %1135 = vmatpush.bf16.msra.mxu0 %v1094_v48  ;;  %v2729_v48 = vor.u32 %v3119_v45, %v2728_v43 }
  0x91   : >> { %1148 = vmatpush.bf16.msra.mxu1 %v1097_v49  ;;  %v2733_v49 = vor.u32 %v3118_v46, %v2730_v47 }
  0x93   : >> { %1208 = vmatpush.bf16.msra.mxu2 %v2694_v28 }
  0x94   : >> { %1221 = vmatpush.bf16.msra.mxu3 %v2698_v29  ;;  %1136 = vmatpush.bf16.msra.mxu0 %v2659_v54  ;;  %v2721_v54 = vor.u32 %v3117_v51, %v2720_v50  ;;  %v2798_v50 = vld [vmem:[%s3444_s10 + $0x250] sm:$0xf]  ;;  %v3131_v51 = vld [vmem:[%s3444_s10 + $0x254] sm:$0xf0] }
  0x95   : >> { %1149 = vmatpush.bf16.msra.mxu1 %v2663_v55  ;;  %v2725_v55 = vor.u32 %v3116_v52, %v2722_v53  ;;  %v3130_v52 = vld [vmem:[%s3444_s10 + $0x254] sm:$0xf]  ;;  %v2800_v53 = vld [vmem:[%s3444_s10 + $0x258] sm:$0xf0] }
  0x97   : >> { %1209 = vmatpush.bf16.msra.mxu2 %v2686_v34 }
  0x98   : >> { %1222 = vmatpush.bf16.msra.mxu3 %v2690_v35  ;;  %1137 = vmatpush.bf16.msra.mxu0 %v2651_v60  ;;  %v2772_v60 = vor.u32 %v3127_v57, %v2771_v56  ;;  %v2790_v56 = vld [vmem:[%s3444_s10 + $0x240] sm:$0xf]  ;;  %v3129_v57 = vld [vmem:[%s3444_s10 + $0x244] sm:$0xf0] }
  0x99   : >> { %1150 = vmatpush.bf16.msra.mxu1 %v2655_v61  ;;  %v2776_v61 = vor.u32 %v3126_v58, %v2773_v59  ;;  %v3128_v59 = vld [vmem:[%s3444_s10 + $0x244] sm:$0xf] }
  0x9a   : >> { %v1403_v17 = vand.u32 %v2772_v60, %v3446_v19  ;;  %v2792_v60 = vld [vmem:[%s3444_s10 + $0x248] sm:$0xf0] }
  0x9b   : >> { %v1406_v18 = vand.u32 %v2776_v61, %v3446_v19 }
  0x9d   : >> { %2639 = vmatmul.msk.bf16.vlgmr.msrb.gmra.mxu0 %vm310_vm2, %v3388_v9 }
  0x9e   : >> { %2640 = vmatmul.msk.bf16.vlgmr.msrb.gmra.mxu1 %vm310_vm2, %v3388_v9  ;;  %2672 = vmatmul.msk.bf16.vlgmr.msrb.gmra.mxu2 %vm310_vm2, %v3388_v9 }
  0x9f   : >> { %2673 = vmatmul.msk.bf16.vlgmr.msrb.gmra.mxu3 %vm310_vm2, %v3388_v9  ;;  %1310 = vmatpush.bf16.msrb.mxu2 %v1300_v42 }
  0xa0   : >> { %1323 = vmatpush.bf16.msrb.mxu3 %v1303_v44  ;;  %1238 = vmatpush.bf16.msrb.mxu0 %v1197_v22  ;;  %v3124_v22 = vld [vmem:[%s3444_s10 + $0x224] sm:$0xf] }
  0xa1   : >> { %1251 = vmatpush.bf16.msrb.mxu1 %v1200_v23  ;;  %v2765_v23 = vld [vmem:[%s3444_s10 + $0x228] sm:$0xf0] }
  0xa2   : >> { %v3686_v25 = vor.u32 %v3124_v22, %v2765_v23  ;;  %v2795_v22 = vor.u32 %v3128_v59, %v2792_v60  ;;  %v2841_v23 = vld [vmem:[%s3444_s10 + $0x290] sm:$0xf]  ;;  %v2878_v59 = vld [vmem:[%s3444_s10 + $0x2c8] sm:$0x70] }
  0xa3   : >> { %1311 = vmatpush.bf16.msrb.mxu2 %v2729_v48 }
  0xa4   : >> { %1324 = vmatpush.bf16.msrb.mxu3 %v2733_v49  ;;  %1239 = vmatpush.bf16.msrb.mxu0 %v2694_v28 }
  0xa5   : >> { %1252 = vmatpush.bf16.msrb.mxu1 %v2698_v29  ;;  %v3122_v29 = vld [vmem:[%s3444_s10 + $0x214] sm:$0xf] }
  0xa6   : >> { %v2760_v37 = vor.u32 %v3122_v29, %v2757_v30 }
  0xa7   : >> { %1312 = vmatpush.bf16.msrb.mxu2 %v2721_v54 }
  0xa8   : >> { %1325 = vmatpush.bf16.msrb.mxu3 %v2725_v55  ;;  %1240 = vmatpush.bf16.msrb.mxu0 %v2686_v34 }
  0xa9   : >> { %1253 = vmatpush.bf16.msrb.mxu1 %v2690_v35 }
  0xaa   : >> { %v333_v62 = vpop.f32.mrf.mxu0 }
  0xab   : >> { %v346_v63 = vpop.f32.mrf.mxu1 }
  0xad   : >> { %2674 = vmatmul.msk.bf16.vlgmr.msra.gmra.mxu0 %vm310_vm2, %v3393_v10 }
  0xae   : >> { %2675 = vmatmul.msk.bf16.vlgmr.msra.gmra.mxu1 %vm310_vm2, %v3393_v10  ;;  %2707 = vmatmul.msk.bf16.vlgmr.msra.gmra.mxu2 %vm310_vm2, %v3393_v10 }
  0xaf   : >> { %2708 = vmatmul.msk.bf16.vlgmr.msra.gmra.mxu3 %vm310_vm2, %v3393_v10  ;;  %1413 = vmatpush.bf16.msra.mxu2 %v1403_v17 }
  0xb0   : >> { %1426 = vmatpush.bf16.msra.mxu3 %v1406_v18  ;;  %1341 = vmatpush.bf16.msra.mxu0 %v1300_v42  ;;  %v2807_v42 = vor.u32 %v3133_v39, %v2806_v38 }
  0xb1   : >> { %v396_v28 = vpop.f32.mrf.mxu2  ;;  %1354 = vmatpush.bf16.msra.mxu1 %v1303_v44  ;;  %v2811_v44 = vor.u32 %v3132_v40, %v2808_v41  ;;  %v2833_v40 = vld [vmem:[%s3444_s10 + $0x280] sm:$0xf]  ;;  %v3137_v41 = vld [vmem:[%s3444_s10 + $0x284] sm:$0xf0] }
  0xb2   : >> { %v3692_v31 = vadd.f32 %v396_v28, %v333_v62  ;;  %v409_v32 = vpop.f32.mrf.mxu3  ;;  %v335_v33 = vpop.f32.mrf.mxu0  ;;  %v2842_v28 = vor.u32 %v3139_v26, %v2841_v23 }
  0xb3   : >> { %v3694_v34 = vadd.f32 %v409_v32, %v346_v63  ;;  %v348_v35 = vpop.f32.mrf.mxu1  ;;  %1414 = vmatpush.bf16.msra.mxu2 %v3684_v24 }
  0xb4   : >> { %1427 = vmatpush.bf16.msra.mxu3 %v3686_v25  ;;  %1342 = vmatpush.bf16.msra.mxu0 %v2729_v48  ;;  %v1506_v48 = vand.u32 %v2807_v42, %v3446_v19  ;;  %v2825_v42 = vld [vmem:[%s3444_s10 + $0x270] sm:$0xf] }
  0xb5   : >> { %1355 = vmatpush.bf16.msra.mxu1 %v2733_v49  ;;  %v3704_v49 = vand.u32 %v2811_v44, %v3446_v19  ;;  %v3135_v44 = vld [vmem:[%s3444_s10 + $0x274] sm:$0xf0] }
  0xb7   : >> { %1415 = vmatpush.bf16.msra.mxu2 %v2756_v36 }
  0xb8   : >> { %1428 = vmatpush.bf16.msra.mxu3 %v2760_v37  ;;  %1343 = vmatpush.bf16.msra.mxu0 %v2721_v54  ;;  %v3718_v54 = vor.u32 %v3131_v51, %v2798_v50 }
  0xb9   : >> { %v398_v43 = vpop.f32.mrf.mxu2  ;;  %1356 = vmatpush.bf16.msra.mxu1 %v2725_v55  ;;  %v3721_v55 = vor.u32 %v3130_v52, %v2800_v53 }
  0xba   : >> { %v411_v45 = vpop.f32.mrf.mxu3  ;;  %v466_v46 = vpop.f32.mrf.mxu0 }
  0xbb   : >> { %v479_v47 = vpop.f32.mrf.mxu1  ;;  %v3134_v45 = vld [vmem:[%s3444_s10 + $0x274] sm:$0xf] }
  0xbd   : >> { %2709 = vmatmul.msk.bf16.vlgmr.msrb.gmra.mxu0 %vm310_vm2, %v3398_v11 }
  0xbe   : >> { %2710 = vmatmul.msk.bf16.vlgmr.msrb.gmra.mxu1 %vm310_vm2, %v3398_v11  ;;  %2742 = vmatmul.msk.bf16.vlgmr.msrb.gmra.mxu2 %vm310_vm2, %v3398_v11 }
  0xbf   : >> { %2743 = vmatmul.msk.bf16.vlgmr.msrb.gmra.mxu3 %vm310_vm2, %v3398_v11  ;;  %1516 = vmatpush.bf16.msrb.mxu2 %v1506_v48 }
  0xc0   : >> { %1529 = vmatpush.bf16.msrb.mxu3 %v3704_v49  ;;  %1444 = vmatpush.bf16.msrb.mxu0 %v1403_v17  ;;  %v2791_v17 = vor.u32 %v3129_v57, %v2790_v56  ;;  %v2876_v57 = vld [vmem:[%s3444_s10 + $0x2c0] sm:$0xf] }
  0xc1   : >> { %v492_v58 = vpop.f32.mrf.mxu2  ;;  %1457 = vmatpush.bf16.msrb.mxu1 %v1406_v18  ;;  %v3138_v18 = vld [vmem:[%s3444_s10 + $0x294] sm:$0xf] }
  0xc2   : >> { %v493_v61 = vadd.f32 %v492_v58, %v466_v46  ;;  %v505_v62 = vpop.f32.mrf.mxu3  ;;  %v468_v63 = vpop.f32.mrf.mxu0  ;;  %v2846_v29 = vor.u32 %v3138_v18, %v2843_v27  ;;  %v2827_v46 = vld [vmem:[%s3444_s10 + $0x278] sm:$0xf0]  ;;  %v3145_v58 = vld [vmem:[%s3444_s10 + $0x2c4] sm:$0x70]  ;;  %v2868_v18 = vld [vmem:[%s3444_s10 + $0x2b0] sm:$0xf] }
  0xc3   : >> { %v506_v20 = vadd.f32 %v505_v62, %v479_v47  ;;  %v481_v21 = vpop.f32.mrf.mxu1  ;;  %1517 = vmatpush.bf16.msrb.mxu2 %v3718_v54  ;;  %v2830_v56 = vor.u32 %v3134_v45, %v2827_v46  ;;  %v2877_v60 = vor.u32 %v3145_v58, %v2876_v57  ;;  %v3143_v27 = vld [vmem:[%s3444_s10 + $0x2b4] sm:$0xf0]  ;;  %v2913_v45 = vld [vmem:[%s3444_s10 + $0x2f8] sm:$0x70] }
  0xc4   : >> { %1530 = vmatpush.bf16.msrb.mxu3 %v3721_v55  ;;  %1445 = vmatpush.bf16.msrb.mxu0 %v3684_v24  ;;  %v3739_v39 = vand.u32 %v2846_v29, %v3446_v19 }
  0xc5   : >> { %1458 = vmatpush.bf16.msrb.mxu1 %v3686_v25  ;;  %v1609_v25 = vand.u32 %v2842_v28, %v3446_v19  ;;  %v1712_v23 = vand.u32 %v2877_v60, %v3446_v19  ;;  %v3787_v28 = vor.u32 %v3143_v27, %v2868_v18 }
  0xc7   : >> { %1518 = vmatpush.bf16.msrb.mxu2 %v2791_v17 }
  0xc8   : >> { %1531 = vmatpush.bf16.msrb.mxu3 %v2795_v22  ;;  %1446 = vmatpush.bf16.msrb.mxu0 %v2756_v36  ;;  %v3136_v36 = vld [vmem:[%s3444_s10 + $0x284] sm:$0xf] }
  0xc9   : >> { %v494_v30 = vpop.f32.mrf.mxu2  ;;  %1459 = vmatpush.bf16.msrb.mxu1 %v2760_v37  ;;  %v2835_v37 = vld [vmem:[%s3444_s10 + $0x288] sm:$0xf0] }
  0xca   : >> { %v507_v32 = vpop.f32.mrf.mxu3  ;;  %v521_v24 = vpop.f32.mrf.mxu0  ;;  %v2860_v30 = vld [vmem:[%s3444_s10 + $0x2a0] sm:$0xf] }
  0xcb   : >> { %v538_v33 = vadd.f32 %v521_v24, %v3692_v31  ;;  %v534_v35 = vpop.f32.mrf.mxu1  ;;  %v3753_v31 = vor.u32 %v3137_v41, %v2833_v40  ;;  %v3141_v32 = vld [vmem:[%s3444_s10 + $0x2a4] sm:$0xf0] }
  0xcc   : >> { %v539_v38 = vadd.f32 %v534_v35, %v3694_v34  ;;  %v3756_v34 = vor.u32 %v3136_v36, %v2835_v37  ;;  %v2862_v35 = vld [vmem:[%s3444_s10 + $0x2a8] sm:$0xf0] }
  0xcd   : >> { %2744 = vmatmul.msk.bf16.vlgmr.msra.gmra.mxu0 %vm310_vm2, %v3403_v12 }
  0xce   : >> { %2745 = vmatmul.msk.bf16.vlgmr.msra.gmra.mxu1 %vm310_vm2, %v3403_v12  ;;  %2777 = vmatmul.msk.bf16.vlgmr.msra.gmra.mxu2 %vm310_vm2, %v3403_v12 }
  0xcf   : >> { %2778 = vmatmul.msk.bf16.vlgmr.msra.gmra.mxu3 %vm310_vm2, %v3403_v12  ;;  %1619 = vmatpush.bf16.msra.mxu2 %v1609_v25 }
  0xd0   : >> { %1632 = vmatpush.bf16.msra.mxu3 %v3739_v39  ;;  %1547 = vmatpush.bf16.msra.mxu0 %v1506_v48  ;;  %v2826_v48 = vor.u32 %v3135_v44, %v2825_v42  ;;  %v2911_v44 = vld [vmem:[%s3444_s10 + $0x2f0] sm:$0xf] }
  0xd1   : >> { %v593_v43 = vpop.f32.mrf.mxu2  ;;  %1560 = vmatpush.bf16.msra.mxu1 %v3704_v49  ;;  %v3144_v49 = vld [vmem:[%s3444_s10 + $0x2c4] sm:$0xf] }
  0xd2   : >> { %v610_v47 = vadd.f32 %v593_v43, %v493_v61  ;;  %v606_v50 = vpop.f32.mrf.mxu3  ;;  %v523_v51 = vpop.f32.mrf.mxu0  ;;  %v2881_v61 = vor.u32 %v3144_v49, %v2878_v59  ;;  %v3151_v43 = vld [vmem:[%s3444_s10 + $0x2f4] sm:$0x70]  ;;  %v2903_v49 = vld [vmem:[%s3444_s10 + $0x2e0] sm:$0xf]  ;;  %v3149_v59 = vld [vmem:[%s3444_s10 + $0x2e4] sm:$0xf0] }
  0xd3   : >> { %v611_v52 = vadd.f32 %v606_v50, %v506_v20  ;;  %v536_v53 = vpop.f32.mrf.mxu1  ;;  %1620 = vmatpush.bf16.msra.mxu2 %v3753_v31  ;;  %v2912_v46 = vor.u32 %v3151_v43, %v2911_v44 }
  0xd4   : >> { %1633 = vmatpush.bf16.msra.mxu3 %v3756_v34  ;;  %1548 = vmatpush.bf16.msra.mxu0 %v3718_v54  ;;  %v3773_v26 = vand.u32 %v2881_v61, %v3446_v19  ;;  %v2895_v61 = vld [vmem:[%s3444_s10 + $0x2d0] sm:$0xf] }
  0xd5   : >> { %1561 = vmatpush.bf16.msra.mxu1 %v3721_v55  ;;  %v1815_v57 = vand.u32 %v2912_v46, %v3446_v19 }
  0xd7   : >> { %1621 = vmatpush.bf16.msra.mxu2 %v2826_v48 }
  0xd8   : >> { %1634 = vmatpush.bf16.msra.mxu3 %v2830_v56  ;;  %1549 = vmatpush.bf16.msra.mxu0 %v2791_v17  ;;  %v3142_v17 = vld [vmem:[%s3444_s10 + $0x2b4] sm:$0xf] }
  0xd9   : >> { %v595_v62 = vpop.f32.mrf.mxu2  ;;  %1562 = vmatpush.bf16.msra.mxu1 %v2795_v22  ;;  %v2870_v22 = vld [vmem:[%s3444_s10 + $0x2b8] sm:$0xf0] }
  0xda   : >> { %v608_v63 = vpop.f32.mrf.mxu3  ;;  %v624_v54 = vpop.f32.mrf.mxu0  ;;  %v3790_v29 = vor.u32 %v3142_v17, %v2870_v22  ;;  %v3147_v62 = vld [vmem:[%s3444_s10 + $0x2d4] sm:$0xf0] }
  0xdb   : >> { %v641_v20 = vadd.f32 %v624_v54, %v538_v33  ;;  %v637_v21 = vpop.f32.mrf.mxu1  ;;  %v3140_v33 = vld [vmem:[%s3444_s10 + $0x2a4] sm:$0xf]  ;;  %v3146_v54 = vld [vmem:[%s3444_s10 + $0x2d4] sm:$0xf]  ;;  %v2896_v22 = vor.u32 %v3147_v62, %v2895_v61 }
  0xdc   : >> { %v642_v55 = vadd.f32 %v637_v21, %v539_v38  ;;  %v2865_v42 = vor.u32 %v3140_v33, %v2862_v35 }
  0xdd   : >> { %2779 = vmatmul.msk.bf16.vlgmr.msrb.gmra.mxu0 %vm310_vm2, %v3413_v13 }
  0xde   : >> { %2780 = vmatmul.msk.bf16.vlgmr.msrb.gmra.mxu1 %vm310_vm2, %v3413_v13  ;;  %2812 = vmatmul.msk.bf16.vlgmr.msrb.gmra.mxu2 %vm310_vm2, %v3413_v13 }
  0xdf   : >> { %2813 = vmatmul.msk.bf16.vlgmr.msrb.gmra.mxu3 %vm310_vm2, %v3413_v13  ;;  %1722 = vmatpush.bf16.msrb.mxu2 %v1712_v23 }
  0xe0   : >> { %1735 = vmatpush.bf16.msrb.mxu3 %v3773_v26  ;;  %1650 = vmatpush.bf16.msrb.mxu0 %v1609_v25  ;;  %v2861_v25 = vor.u32 %v3141_v32, %v2860_v30 }
  0xe1   : >> { %v696_v24 = vpop.f32.mrf.mxu2  ;;  %1663 = vmatpush.bf16.msrb.mxu1 %v3739_v39  ;;  %v3150_v39 = vld [vmem:[%s3444_s10 + $0x2f4] sm:$0xf] }
  0xe2   : >> { %v713_v38 = vadd.f32 %v696_v24, %v610_v47  ;;  %v709_v40 = vpop.f32.mrf.mxu3  ;;  %v626_v41 = vpop.f32.mrf.mxu0  ;;  %v2916_v47 = vor.u32 %v3150_v39, %v2913_v45 }
  0xe3   : >> { %v714_v36 = vadd.f32 %v709_v40, %v611_v52  ;;  %v639_v37 = vpop.f32.mrf.mxu1  ;;  %1723 = vmatpush.bf16.msrb.mxu2 %v3787_v28 }
  0xe4   : >> { %1736 = vmatpush.bf16.msrb.mxu3 %v3790_v29  ;;  %1651 = vmatpush.bf16.msrb.mxu0 %v3753_v31  ;;  %v1818_v58 = vand.u32 %v2916_v47, %v3446_v19  ;;  %v2904_v19 = vor.u32 %v3149_v59, %v2903_v49 }
  0xe5   : >> { %1664 = vmatpush.bf16.msrb.mxu1 %v3756_v34 }
  0xe7   : >> { %1724 = vmatpush.bf16.msrb.mxu2 %v2861_v25 }
  0xe8   : >> { %1737 = vmatpush.bf16.msrb.mxu3 %v2865_v42  ;;  %1652 = vmatpush.bf16.msrb.mxu0 %v2826_v48  ;;  %v3148_v48 = vld [vmem:[%s3444_s10 + $0x2e4] sm:$0xf] }
  0xe9   : >> { %v698_v50 = vpop.f32.mrf.mxu2  ;;  %1665 = vmatpush.bf16.msrb.mxu1 %v2830_v56  ;;  %v2905_v56 = vld [vmem:[%s3444_s10 + $0x2e8] sm:$0xf0] }
  0xea   : >> { %v711_v51 = vpop.f32.mrf.mxu3  ;;  %v727_v31 = vpop.f32.mrf.mxu0  ;;  %v2908_v60 = vor.u32 %v3148_v48, %v2905_v56 }
  0xeb   : >> { %v744_v52 = vadd.f32 %v727_v31, %v641_v20  ;;  %v740_v53 = vpop.f32.mrf.mxu1  ;;  %v2897_v20 = vld [vmem:[%s3444_s10 + $0x2d8] sm:$0xf0] }
  0xec   : >> { %v745_v34 = vadd.f32 %v740_v53, %v642_v55  ;;  %v2900_v30 = vor.u32 %v3146_v54, %v2897_v20 }
  0xed   : >> { %2814 = vmatmul.msk.bf16.vlgmr.msra.gmra.mxu0 %vm310_vm2, %v3418_v14 }
  0xee   : >> { %2815 = vmatmul.msk.bf16.vlgmr.msra.gmra.mxu1 %vm310_vm2, %v3418_v14  ;;  %2847 = vmatmul.msk.bf16.vlgmr.msra.gmra.mxu2 %vm310_vm2, %v3418_v14 }
  0xef   : >> { %2848 = vmatmul.msk.bf16.vlgmr.msra.gmra.mxu3 %vm310_vm2, %v3418_v14  ;;  %1825 = vmatpush.bf16.msra.mxu2 %v1815_v57 }
  0xf0   : >> { %1838 = vmatpush.bf16.msra.mxu3 %v1818_v58  ;;  %1753 = vmatpush.bf16.msra.mxu0 %v1712_v23  ;;  %v3280_v23 = vmov 0  }
  0xf1   : >> { %v799_v63 = vpop.f32.mrf.mxu2  ;;  %1766 = vmatpush.bf16.msra.mxu1 %v3773_v26  ;;  %3230 = vset.pattern.permute.xlu0 %v3280_v23 }
  0xf2   : >> { %v816_v21 = vadd.f32 %v799_v63, %v713_v38  ;;  %v812_v55 = vpop.f32.mrf.mxu3  ;;  %v729_v18 = vpop.f32.mrf.mxu0  ;;  %1852 = vperm.xlu0 %3230, %v3342_v0  }
  0xf3   : >> { %v817_v27 = vadd.f32 %v812_v55, %v714_v36  ;;  %v742_v17 = vpop.f32.mrf.mxu1  ;;  %1826 = vmatpush.bf16.msra.mxu2 %v2904_v19 }
  0xf4   : >> { %1839 = vmatpush.bf16.msra.mxu3 %v2908_v60  ;;  %1754 = vmatpush.bf16.msra.mxu0 %v3787_v28 }
  0xf5   : >> { %1767 = vmatpush.bf16.msra.mxu1 %v3790_v29 }
  0xf7   : >> { %1827 = vmatpush.bf16.msra.mxu2 %v2896_v22 }
  0xf8   : >> { %1840 = vmatpush.bf16.msra.mxu3 %v2900_v30  ;;  %1755 = vmatpush.bf16.msra.mxu0 %v2861_v25 }
  0xf9   : >> { %v801_v26 = vpop.f32.mrf.mxu2  ;;  %1768 = vmatpush.bf16.msra.mxu1 %v2865_v42 }
  0xfa   : >> { %v814_v32 = vpop.f32.mrf.mxu3  ;;  %v830_v24 = vpop.f32.mrf.mxu0  ;;  %1859 = vperm.xlu0 %3230, %v3347_v1  }
  0xfb   : >> { %v847_v33 = vadd.f32 %v830_v24, %v744_v52  ;;  %v843_v35 = vpop.f32.mrf.mxu1 }
  0xfc   : >> { %v848_v38 = vadd.f32 %v843_v35, %v745_v34 }
  0xfd   : >> { %2849 = vmatmul.msk.bf16.vlgmr.msrb.gmra.mxu0 %vm310_vm2, %v3423_v15 }
  0xfe   : >> { %2850 = vmatmul.msk.bf16.vlgmr.msrb.gmra.mxu1 %vm310_vm2, %v3423_v15  ;;  %2882 = vmatmul.msk.bf16.vlgmr.msrb.gmra.mxu2 %vm310_vm2, %v3423_v15 }
  0xff   : >> { %2883 = vmatmul.msk.bf16.vlgmr.msrb.gmra.mxu3 %vm310_vm2, %v3423_v15 }
 0x101   : >> { %v902_v28 = vpop.f32.mrf.mxu2 }
 0x102   : >> { %v919_v29 = vadd.f32 %v902_v28, %v816_v21  ;;  %v915_v40 = vpop.f32.mrf.mxu3  ;;  %v832_v41 = vpop.f32.mrf.mxu0 }
 0x103   : >> { %v920_v36 = vadd.f32 %v915_v40, %v817_v27  ;;  %v845_v37 = vpop.f32.mrf.mxu1 }
 0x109   : >> { %v904_v25 = vpop.f32.mrf.mxu2 }
 0x10a   : >> { %v917_v42 = vpop.f32.mrf.mxu3  ;;  %v933_v44 = vpop.f32.mrf.mxu0 }
 0x10b   : >> { %v950_v43 = vadd.f32 %v933_v44, %v847_v33  ;;  %v946_v39 = vpop.f32.mrf.mxu1 }
 0x10c   : >> { %v951_v45 = vadd.f32 %v946_v39, %v848_v38 }
 0x10d   : >> { %2884 = vmatmul.msk.bf16.vlgmr.msra.gmra.mxu0 %vm310_vm2, %v3428_v16 }
 0x10e   : >> { %2885 = vmatmul.msk.bf16.vlgmr.msra.gmra.mxu1 %vm310_vm2, %v3428_v16  ;;  %2917 = vmatmul.msk.bf16.vlgmr.msra.gmra.mxu2 %vm310_vm2, %v3428_v16 }
 0x10f   : >> { %2918 = vmatmul.msk.bf16.vlgmr.msra.gmra.mxu3 %vm310_vm2, %v3428_v16 }
 0x111   : >> { %v1005_v46 = vpop.f32.mrf.mxu2 }
 0x112   : >> { %v1022_v47 = vadd.f32 %v1005_v46, %v919_v29  ;;  %v1018_v50 = vpop.f32.mrf.mxu3  ;;  %v935_v51 = vpop.f32.mrf.mxu0 }
 0x113   : >> { %v1023_v31 = vadd.f32 %v1018_v50, %v920_v36  ;;  %v948_v52 = vpop.f32.mrf.mxu1 }
 0x119   : >> { %v1007_v53 = vpop.f32.mrf.mxu2 }
 0x11a   : >> { %v1020_v57 = vpop.f32.mrf.mxu3  ;;  %v1036_v34 = vpop.f32.mrf.mxu0 }
 0x11b   : >> { %v1053_v58 = vadd.f32 %v1036_v34, %v950_v43  ;;  %v1049_v49 = vpop.f32.mrf.mxu1  ;;  %v3159_v57 = vld [vmem:[%s3987_s3 + $0x38] sm:$0xff]  ;;  %v3172_v34 = vld [vmem:[%s3987_s3 + $0xa4] sm:$0xff] }
 0x11c   : >> { %v1054_v59 = vadd.f32 %v1049_v49, %v951_v45  ;;  %1990 = vmatpush.bf16.msrb.mxu0 %v3159_v57  ;;  %2128 = vmatpush.bf16.msrb.mxu2 %v3172_v34  ;;  %v3175_v57 = vld [vmem:[%s3987_s3 + $0xbc] sm:$0xff]  ;;  %v3153_v34 = vld [vmem:[%s3987_s3 + $0x8] sm:$0xff] }
 0x121   : >> { %v1108_v48 = vpop.f32.mrf.mxu2 }
 0x122   : >> { %v1125_v56 = vadd.f32 %v1108_v48, %v1022_v47  ;;  %v1121_v19 = vpop.f32.mrf.mxu3  ;;  %v1038_v60 = vpop.f32.mrf.mxu0  ;;  %v3158_v48 = vld [vmem:[%s3987_s3 + $0x30] sm:$0xff] }
 0x123   : >> { %v1126_v61 = vadd.f32 %v1121_v19, %v1023_v31  ;;  %v1051_v62 = vpop.f32.mrf.mxu1  ;;  %v1900_v19 = vld [vmem:[%s3987_s3 + $0x68] sm:$0x1]  ;;  %1991 = vmatpush.bf16.msrb.mxu0 %v3158_v48  ;;  %v3166_v48 = vld [vmem:[%s3987_s3 + $0x74] sm:$0xff] }
 0x124   : >> { %v2998_v62 = vld [vmem:[%s3987_s3 + $0xd4] sm:$0x1] }
 0x129   : >> { %v1110_v63 = vpop.f32.mrf.mxu2 }
 0x12a   : >> { %v1123_v54 = vpop.f32.mrf.mxu3  ;;  %v1139_v20 = vpop.f32.mrf.mxu0  ;;  %v3157_v63 = vld [vmem:[%s3987_s3 + $0x28] sm:$0xff] }
 0x12b   : >> { %v1156_v21 = vadd.f32 %v1139_v20, %v1053_v58  ;;  %v1152_v55 = vpop.f32.mrf.mxu1  ;;  %v2097_v54 = vunpack.c.l.b16 %v2998_v62  ;;  %1992 = vmatpush.bf16.msrb.mxu0 %v3157_v63  ;;  %v3152_v62 = vld [vmem:[%s3987_s3] sm:$0xff] }
 0x12c   : >> { %v1157_v18 = vadd.f32 %v1152_v55, %v1054_v59  ;;  %v3160_v63 = vld [vmem:[%s3987_s3 + $0x40] sm:$0xff] }
 0x12d   : >> { %v2111_v55 = vpack.c.b16 %v2097_v54, %v2097_v54  ;;  %v3165_v54 = vld [vmem:[%s3987_s3 + $0x6c] sm:$0xff] }
 0x131   : >> { %v1211_v27 = vpop.f32.mrf.mxu2 }
 0x132   : >> { %v1228_v17 = vadd.f32 %v1211_v27, %v1125_v56  ;;  %v1224_v22 = vpop.f32.mrf.mxu3  ;;  %v1141_v30 = vpop.f32.mrf.mxu0  ;;  %v3171_v56 = vld [vmem:[%s3987_s3 + $0x9c] sm:$0xff]  ;;  %v2126_v27 = vsel %vm1986_vm3, %v2111_v55, 0 }
 0x133   : >> { %v1229_v23 = vadd.f32 %v1224_v22, %v1126_v61  ;;  %v1154_v26 = vpop.f32.mrf.mxu1  ;;  %v1954_v61 = vunpack.c.l.b16 %v1900_v19  ;;  %2129 = vmatpush.bf16.msrb.mxu2 %v3171_v56  ;;  %2143 = vmatpush.bf16.msrb.mxu3 %v2126_v27  ;;  %v3174_v56 = vld [vmem:[%s3987_s3 + $0xb4] sm:$0xff] }
 0x134   : >> { %v3164_v26 = vld [vmem:[%s3987_s3 + $0x60] sm:$0xff] }
 0x135   : >> { %v1968_v20 = vpack.c.b16 %v1954_v61, %v1954_v61 }
 0x139   : >> { %v1213_v32 = vpop.f32.mrf.mxu2 }
 0x13a   : >> { %v1226_v24 = vpop.f32.mrf.mxu3  ;;  %v1242_v33 = vpop.f32.mrf.mxu0  ;;  %v3169_v32 = vld [vmem:[%s3987_s3 + $0x8c] sm:$0xff] }
 0x13b   : >> { %v3844_v35 = vadd.f32 %v1242_v33, %v1156_v21  ;;  %v1255_v38 = vpop.f32.mrf.mxu1  ;;  %v3170_v21 = vld [vmem:[%s3987_s3 + $0x94] sm:$0xff]  ;;  %v3177_v33 = vld [vmem:[%s3987_s3 + $0xcc] sm:$0xff] }
 0x13c   : >> { %v3846_v28 = vadd.f32 %v1255_v38, %v1157_v18  ;;  %v1988_v18 = vsel %vm1986_vm3, %v1968_v20, 0  ;;  %2130 = vmatpush.bf16.msrb.mxu2 %v3170_v21  ;;  %2144 = vmatpush.bf16.msrb.mxu3 %v3177_v33  ;;  %v3155_v38 = vld [vmem:[%s3987_s3 + $0x18] sm:$0xff]  ;;  %v3173_v21 = vld [vmem:[%s3987_s3 + $0xac] sm:$0xff] }
 0x13d   : >> { %2005 = vmatpush.bf16.msrb.mxu1 %v1988_v18 }
 0x140   : >> { %2131 = vmatpush.bf16.msrb.mxu2 %v3169_v32 }
 0x141   : >> { %v1314_v29 = vpop.f32.mrf.mxu2  ;;  %2006 = vmatpush.bf16.msrb.mxu1 %v3164_v26 }
 0x142   : >> { %v3848_v40 = vadd.f32 %v1314_v29, %v1228_v17  ;;  %v1327_v41 = vpop.f32.mrf.mxu3  ;;  %v1244_v36 = vpop.f32.mrf.mxu0  ;;  %v3163_v29 = vld [vmem:[%s3987_s3 + $0x58] sm:$0xff] }
 0x143   : >> { %v3850_v37 = vadd.f32 %v1327_v41, %v1229_v23  ;;  %v1257_v25 = vpop.f32.mrf.mxu1  ;;  %v3156_v23 = vld [vmem:[%s3987_s3 + $0x20] sm:$0xff] }
 0x144   : >> { %1993 = vmatpush.bf16.msrb.mxu0 %v3156_v23  ;;  %v3168_v41 = vld [vmem:[%s3987_s3 + $0x84] sm:$0xff] }
 0x145   : >> { %v3176_v36 = vld [vmem:[%s3987_s3 + $0xc4] sm:$0xff]  ;;  %2007 = vmatpush.bf16.msrb.mxu1 %v3163_v29  ;;  %2132 = vmatpush.bf16.msrb.mxu2 %v3168_v41 }
 0x146   : >> { %2145 = vmatpush.bf16.msrb.mxu3 %v3176_v36 }
 0x148   : >> { %1994 = vmatpush.bf16.msrb.mxu0 %v3155_v38 }
 0x149   : >> { %v1316_v42 = vpop.f32.mrf.mxu2 }
 0x14a   : >> { %v1329_v44 = vpop.f32.mrf.mxu3  ;;  %v3852_v43 = vpop.f32.mrf.mxu0  ;;  %2146 = vmatpush.bf16.msrb.mxu3 %v3175_v57 }
 0x14b   : >> { %v3854_v39 = vpop.f32.mrf.mxu1 }
 0x14c   : >> { %v1363_v23 = vadd.f32 %v3854_v39, %v3846_v28 }
 0x14e   : >> { %2147 = vmatpush.bf16.msrb.mxu3 %v3174_v56 }
 0x151   : >> { %v3856_v45 = vpop.f32.mrf.mxu2 }
 0x152   : >> { %v3858_v46 = vpop.f32.mrf.mxu3  ;;  %v1347_v47 = vpop.f32.mrf.mxu0  ;;  %2148 = vmatpush.bf16.msrb.mxu3 %v3173_v21  ;;  %v1434_v41 = vadd.f32 %v3856_v45, %v3848_v40 }
 0x153   : >> { %v1360_v50 = vpop.f32.mrf.mxu1  ;;  %v3154_v47 = vld [vmem:[%s3987_s3 + $0x10] sm:$0xff] }
 0x154   : >> { %v3162_v50 = vld [vmem:[%s3987_s3 + $0x50] sm:$0xff]  ;;  %1995 = vmatpush.bf16.msrb.mxu0 %v3154_v47 }
 0x155   : >> { %2008 = vmatpush.bf16.msrb.mxu1 %v3162_v50  ;;  %v1435_v50 = vadd.f32 %v3858_v46, %v3850_v37 }
 0x158   : >> { %1996 = vmatpush.bf16.msrb.mxu0 %v3153_v34 }
 0x159   : >> { %v1419_v51 = vpop.f32.mrf.mxu2 }
 0x15a   : >> { %v1432_v31 = vpop.f32.mrf.mxu3  ;;  %v3860_v52 = vpop.f32.mrf.mxu0  ;;  %v3167_v51 = vld [vmem:[%s3987_s3 + $0x7c] sm:$0xff] }
 0x15b   : >> { %v3862_v53 = vpop.f32.mrf.mxu1  ;;  %2133 = vmatpush.bf16.msrb.mxu2 %v3167_v51 }
 0x15c   : >> { %1997 = vmatpush.bf16.msrb.mxu0 %v3152_v62  ;;  %v1466_v32 = vadd.f32 %v3862_v53, %v1363_v23 }
 0x15f   : >> { %2134 = vmatpush.bf16.msrb.mxu2 %v3166_v48 }
 0x161   : >> { %v3870_v58 = vpop.f32.mrf.mxu2 }
 0x162   : >> { %v3872_v49 = vpop.f32.mrf.mxu3  ;;  %v1450_v59 = vpop.f32.mrf.mxu0  ;;  %v1537_v28 = vadd.f32 %v3870_v58, %v1434_v41 }
 0x163   : >> { %v1463_v60 = vpop.f32.mrf.mxu1  ;;  %v3161_v59 = vld [vmem:[%s3987_s3 + $0x48] sm:$0xff]  ;;  %2135 = vmatpush.bf16.msrb.mxu2 %v3165_v54 }
 0x164   : >> { %2009 = vmatpush.bf16.msrb.mxu1 %v3161_v59  ;;  %v1853_v53 = vpop.permute.xlu0 %1852 }
 0x168   : >> { %2010 = vmatpush.bf16.msrb.mxu1 %v3160_v63 }
 0x169   : >> { %v1522_v17 = vpop.f32.mrf.mxu2 }
 0x16a   : >> { %v1535_v22 = vpop.f32.mrf.mxu3  ;;  %v1551_v30 = vpop.f32.mrf.mxu0 }
 0x16b   : >> { %v1564_v24 = vpop.f32.mrf.mxu1  ;;  %v1362_v22 = vadd.f32 %v3852_v43, %v3844_v35 }
 0x16c   : >> { %v1569_v38 = vadd.f32 %v1564_v24, %v1466_v32 }
 0x16d   : >> { %v1465_v26 = vadd.f32 %v3860_v52, %v1362_v22  ;;  %v1538_v52 = vadd.f32 %v3872_v49, %v1435_v50  ;;  %v1860_v49 = vpop.permute.xlu0 %1859 }
 0x16f   : >> { %v1568_v33 = vadd.f32 %v1551_v30, %v1465_v26 }
 0x171   : >> { %v1623_v25 = vpop.f32.mrf.mxu2 }
 0x172   : >> { %v1636_v42 = vpop.f32.mrf.mxu3  ;;  %v1553_v44 = vpop.f32.mrf.mxu0  ;;  %v1640_v24 = vadd.f32 %v1623_v25, %v1537_v28 }
 0x173   : >> { %v1566_v31 = vpop.f32.mrf.mxu1  ;;  %v1641_v51 = vadd.f32 %v1636_v42, %v1538_v52 }
 0x179   : >> { %v1625_v19 = vpop.f32.mrf.mxu2 }
 0x17a   : >> { %v1638_v60 = vpop.f32.mrf.mxu3  ;;  %v1654_v61 = vpop.f32.mrf.mxu0 }
 0x17b   : >> { %v1667_v20 = vpop.f32.mrf.mxu1  ;;  %v1671_v36 = vadd.f32 %v1654_v61, %v1568_v33 }
 0x17c   : >> { %v1672_v35 = vadd.f32 %v1667_v20, %v1569_v38 }
 0x181   : >> { %v1726_v55 = vpop.f32.mrf.mxu2 }
 0x182   : >> { %v1739_v18 = vpop.f32.mrf.mxu3  ;;  %v1656_v27 = vpop.f32.mrf.mxu0  ;;  %v1743_v31 = vadd.f32 %v1726_v55, %v1640_v24 }
 0x183   : >> { %v1669_v17 = vpop.f32.mrf.mxu1  ;;  %v1744_v40 = vadd.f32 %v1739_v18, %v1641_v51 }
 0x189   : >> { %v1728_v29 = vpop.f32.mrf.mxu2 }
 0x18a   : >> { %v1741_v44 = vpop.f32.mrf.mxu3  ;;  %v1757_v47 = vpop.f32.mrf.mxu0 }
 0x18b   : >> { %v1770_v43 = vpop.f32.mrf.mxu1  ;;  %v1774_v39 = vadd.f32 %v1757_v47, %v1671_v36 }
 0x18c   : >> { %v1775_v30 = vadd.f32 %v1770_v43, %v1672_v35 }
 0x18d   : >> { %v1848_v57 = vmax.f32 %v1774_v39, 0.0 }
 0x18e   : >> { %v1849_v45 = vmax.f32 %v1775_v30, 0.0 }
 0x18f   : >> { %v1855_v19 = vmul.f32 %v1853_v53, %v1848_v57 }
 0x190   : >> { %v1856_v58 = vmul.f32 %v1853_v53, %v1849_v45 }
 0x191   : >> { %v1829_v34 = vpop.f32.mrf.mxu2  ;;  %v1862_v54 = vadd.f32 %v1860_v49, %v1855_v19 }
 0x192   : >> { %v1846_v59 = vadd.f32 %v1829_v34, %v1743_v31  ;;  %v1842_v48 = vpop.f32.mrf.mxu3  ;;  %v1759_v56 = vpop.f32.mrf.mxu0  ;;  %v1863_v42 = vadd.f32 %v1860_v49, %v1856_v58 }
 0x193   : >> { %v1847_v37 = vadd.f32 %v1842_v48, %v1744_v40  ;;  %v1772_v46 = vpop.f32.mrf.mxu1 }
 0x194   : >> { %v1864_v60 = vmax.f32 %v1846_v59, 0.0 }
 0x195   : >> { %v1865_v61 = vmax.f32 %v1847_v37, 0.0 }
 0x196   : >> { %v1866_v62 = vmul.f32 %v1864_v60, %v1853_v53 }
 0x197   : >> { %v1867_v63 = vmul.f32 %v1865_v61, %v1853_v53 }
 0x198   : >> { %v1868_v25 = vadd.f32 %v1866_v62, %v1860_v49 }
 0x199   : >> { %v1869_v20 = vadd.f32 %v1867_v63, %v1860_v49  ;;  %v1831_v21 = vpop.f32.mrf.mxu2 }
 0x19a   : >> { %v1870_v55 = vmax.f32 %v1862_v54, %v1868_v25  ;;  %v1844_v18 = vpop.f32.mrf.mxu3 }
 0x19b   : >> { %v1871_v27 = vmax.f32 %v1863_v42, %v1869_v20 }
 0x19c   : >> { %v1872_v17 = vpack.c.bf16 %v1870_v55, %v1870_v55 }
 0x19d   : >> { %v1873_v22 = vpack.c.bf16 %v1871_v27, %v1871_v27 }
 0x19e   : >> { %1998 = vmatmul.bf16.vlgmr.msrb.gmra.mxu0 %v1872_v17  ;;  %2136 = vmatmul.bf16.vlgmr.msrb.gmra.mxu2 %v1872_v17 }
 0x19f   : >> { %2971 = vmatmul.msk.bf16.vlgmr.msrb.gmra.mxu1 %vm1982_vm4, %v1873_v22  ;;  %3051 = vmatmul.msk.bf16.vlgmr.msrb.gmra.mxu3 %vm1982_vm4, %v1873_v22 }
 0x21b   : >> { %v1999_v23 = vpop.f32.mrf.mxu0 }
 0x21c   : >> { %v2012_v26 = vpop.f32.mrf.mxu1 }
 0x21d   : >> { %v2013_v38 = vadd.f32 %v2012_v26, %v1999_v23 }
 0x221   : >> { %v2137_v32 = vpop.f32.mrf.mxu2 }
 0x222   : >> { %v2150_v33 = vpop.f32.mrf.mxu3 }
 0x223   : >> { %v2151_v29 = vadd.f32 %v2150_v33, %v2137_v32  ;;  %v2001_v41 = vpop.f32.mrf.mxu0 }
 0x224   : >> { %v2014_v36 = vpop.f32.mrf.mxu1 }
 0x225   : >> { %v2154_v44 = vmax.f32 %v2013_v38, %v2151_v29 }
 0x226   : > { %259 = sbr.rel (!%p257_p7) target bundleno = 24 (0x18), region = 106 }
 0x227   : >> { %v2155_v47 = vpack.c.bf16 %v2154_v44, %v2154_v44 }
 0x229   : >> { %2159 = vst.msk [vmem:[%s2157_s24] sm:$0x7] %vm2158_vm5, %v2155_v47  ;;  %v2139_v50 = vpop.f32.mrf.mxu2 }
 0x22a   : >> { %v2152_v35 = vpop.f32.mrf.mxu3 }
 0x22b PF: > { %s14_s19 = sadd.s32 1, %s3273_s19   ;;  %s3989_s15 = smov %s3265_s17 }
 0x22c   : > { %p11_p8 = scmp.ge.s32.totalorder %s14_s19, 16   ;;  %s3990_s16 = smov %s3269_s18 }
 0x22d   : > { %s3991_s17 = smov %s3994_s20  ;;  %s3992_s18 = smov %s3998_s21 }
 0x22e   :  { %13 = sbr.rel (!%p11_p8) target bundleno = 3 (0x3), region = 117 }

</bundles_post_ra>
